<compile_context>
chip_gen: v5e
topology: v5e:2x2
jax: 0.10.0
libtpu: 0.0.40
codegen_flags: <defaults>
</compile_context>

<pallas_src>
import math

import jax
import jax.numpy as jnp
from jax.experimental import pallas as pl
from jax.experimental.pallas import tpu as pltpu

# ----------------------------- small config ---------------------------------
VOCAB = 128          # reference 32000
MAX_SEQ = 32         # reference 8192
DIM = 32             # reference 2048
DEPTH = 2            # reference 32
NUM_HEADS = 4        # reference 32
INNER_LAYERS = 2     # FractalAttention layers per FractalTransformer (ref 6)
FH, FW = 8, 8        # unipixel field, scaled down from (256, 256)
FIELD = FH * FW
B, L = 2, 8
M = B * L
DH = DIM // NUM_HEADS
N_ATTN = DEPTH * INNER_LAYERS

# bias-slab row offsets (one lane-dense (16,128) f32 slab holds every tiny
# bias / LayerNorm vector; rows sliced statically inside the kernel)
ROW_FEB = 0                      # field_embedding bias      (lanes 0:FIELD)
ROW_FPB = 1                      # field_projection bias     (lanes 0:DIM)
ROW_AOB = 2                      # attn out_proj biases      (N_ATTN rows)
ROW_BNW = ROW_AOB + N_ATTN       # per-block LayerNorm weight (DEPTH rows)
ROW_BNB = ROW_BNW + DEPTH        # per-block LayerNorm bias   (DEPTH rows)
ROW_NW = ROW_BNB + DEPTH         # final LayerNorm weight
ROW_NB = ROW_NW + 1              # final LayerNorm bias
SLAB_ROWS = 16                   # padded to a multiple of 8 sublanes
SLAB_LANES = 128


# ----------------------------- fused Pallas kernel ---------------------------
def _fractal_llm_kernel(x_ref, few_ref, fwd_ref, invr_ref, invi_ref,
                        fpw_ref, ft_ref, hm_ref, bb_ref, aow_ref,
                        bias_ref, hw_ref, logits_ref):
    f32 = jnp.float32
    bf16 = jnp.bfloat16

    def dotb(a, b):
        # bf16 MXU operands (weights already bf16), f32 accumulation.
        return jnp.dot(a.astype(bf16), b, preferred_element_type=f32)

    # ---- hoisted loads: every ref is read exactly once -----------------------
    x = x_ref[...]            # (M, DIM) f32   token + position embeddings
    few = few_ref[...]        # (DIM, FIELD)   bf16 field_embedding weight
    fwd = fwd_ref[...]        # (FIELD, 2F)    bf16 [Re|Im] fwd DFT, scale folded
    invr = invr_ref[...]      # (2F, FIELD)    bf16 [kr;ki]/N
    invi = invi_ref[...]      # (2F, FIELD)    bf16 [-ki;kr]/N
    fpw = fpw_ref[...]        # (FIELD, DIM)   bf16 field_projection weight
    ft = ft_ref[...]          # (DIM, DIM)     bf16 shared fractal transform
    hmask = hm_ref[...]       # (H*M, DIM) f32 head masks tiled along sublanes
    bbias = bb_ref[...]       # (H*M, M)  f32  block-diag batch bias, tiled
    aow = aow_ref[...]        # (N_ATTN*DIM, DIM) bf16 out_proj weights
    bias = bias_ref[...]      # (16, 128) f32  packed bias / norm slab
    hw = hw_ref[...]          # (DIM, VOCAB)   bf16 output head

    feb = bias[ROW_FEB:ROW_FEB + 1, :FIELD]                         # (1, FIELD)
    fpb = jnp.broadcast_to(bias[ROW_FPB:ROW_FPB + 1, :DIM], (M, DIM))

    attn_scale = 1.0 / math.sqrt(DH)

    def field_xform(f):
        # fft2 -> * (w+1)^-1.5 -> * (1+|freq|) -> |ifft2|, in flattened
        # Kronecker-DFT form with scale + 1/(FH*FW) folded into the tables.
        y = dotb(f, fwd)                               # (M, 2F)  [yr | yi]
        sq = y * y
        mag = jnp.sqrt(sq + pltpu.roll(sq, FIELD, axis=1))   # |freq| in both halves
        y = y * (1.0 + mag)
        zr = dotb(y, invr)                             # (M, FIELD)
        zi = dotb(y, invi)
        return jnp.sqrt(zr * zr + zi * zi)

    def layer_norm(h, w, b):
        mu = jnp.mean(h, axis=-1, keepdims=True)
        c = h - mu
        var = jnp.mean(c * c, axis=-1, keepdims=True)  # biased, as torch LN
        return c * jax.lax.rsqrt(var + 1e-5) * w + b

    def attn_block(h, w_o, b_o):
        # q == k == v == h @ transform (q_op/k_op/v_op share deterministic init)
        proj = dotb(h, ft)                             # (M, DIM) f32
        proj_b = proj.astype(bf16)
        # All heads batched along the sublane axis: rows [h*M, (h+1)*M) = head h.
        qm = jnp.concatenate([proj] * NUM_HEADS, axis=0) * hmask   # (H*M, DIM)
        qm_b = qm.astype(bf16)
        # One score GEMM for all heads: (H*M, DIM) x (M, DIM)^T -> (H*M, M).
        s = jax.lax.dot_general(qm_b, proj_b, (((1,), (1,)), ((), ())),
                                preferred_element_type=f32)
        s = s * attn_scale + bbias                     # block-diag batch mask
        s = s - jnp.max(s, axis=-1, keepdims=True)
        p = jnp.exp(s)
        p = p * pl.reciprocal(jnp.sum(p, axis=-1, keepdims=True), approx=True)
        p_b = p.astype(bf16)
        # ctx = sum_h P_h @ QM_h, then ONE out-proj GEMM (W_o hoisted out of the
        # head loop by associativity).  Sublane slice offsets are multiples of 16.
        ctx = None
        for hh in range(NUM_HEADS):
            c = jnp.dot(p_b[hh * M:(hh + 1) * M, :],
                        qm_b[hh * M:(hh + 1) * M, :],
                        preferred_element_type=f32)
            ctx = c if ctx is None else ctx + c
        return dotb(ctx, w_o) + b_o                    # out_proj

    # field = field_embedding(x), computed once before the layer loop
    field = dotb(x, few) + feb                         # (M, FIELD)

    for d in range(DEPTH):
        field = field_xform(field)
        fe = dotb(field, fpw) + fpb                    # field_projection
        h = dotb(x + fe, ft)                           # FractalTransformer.embed
        for li in range(INNER_LAYERS):
            idx = d * INNER_LAYERS + li
            w_o = aow[idx * DIM:(idx + 1) * DIM, :]
            b_o = bias[ROW_AOB + idx:ROW_AOB + idx + 1, :DIM]
            h = attn_block(h, w_o, b_o)
        x = layer_norm(h,
                       bias[ROW_BNW + d:ROW_BNW + d + 1, :DIM],
                       bias[ROW_BNB + d:ROW_BNB + d + 1, :DIM])

    x = layer_norm(x,
                   bias[ROW_NW:ROW_NW + 1, :DIM],
                   bias[ROW_NB:ROW_NB + 1, :DIM])
    logits_ref[...] = dotb(x, hw).astype(logits_ref.dtype)   # output head, no bias


def fractal_llm_forward(tokens, params, tables):
    Bb, Ll = tokens.shape
    x = params['tok_emb'][tokens] + params['pos_emb'][jnp.arange(Ll)][None, :, :]
    x = x.reshape(Bb * Ll, DIM).astype(jnp.float32)

    inputs = (x,
              params['field_emb_w'],
              tables['fwd_dft'], tables['inv_dft_r'], tables['inv_dft_i'],
              params['field_proj_w'], params['fractal_transform'],
              tables['head_mask'], tables['batch_bias'],
              params['attn_out_w'], params['bias_slab'], params['out_w'])

    # TODO(synk): at reference sizes (DIM=2048, VOCAB=32000, seq=8192) this
    # grid-less all-in-VMEM design must be re-tiled with a BlockSpec grid over
    # sequence/batch (and a 2-wide 'parallel' axis to use both v7x TensorCores)
    # plus pltpu.CompilerParams(vmem_limit_bytes=...); unnecessary at toy sizes.
    logits = pl.pallas_call(
        _fractal_llm_kernel,
        out_shape=jax.ShapeDtypeStruct((Bb * Ll, VOCAB), jnp.float32),
        in_specs=[pl.BlockSpec(memory_space=pltpu.MemorySpace.VMEM)
                  for _ in inputs],
        out_specs=pl.BlockSpec(memory_space=pltpu.MemorySpace.VMEM),
    )(*inputs)
    return logits.reshape(Bb, Ll, VOCAB)


# ----------------------------- constants & parameters ------------------------
def fractal_transform_init(dim):
    """Exact port of FractalNeuralOperator._initialize_fractal_transform."""
    d = min(dim, 64)
    x = jnp.linspace(-0.5, 0.5, d)
    X, Y = jnp.meshgrid(x, x, indexing='ij')
    R = jnp.sqrt(X ** 2 + Y ** 2)
    Theta = jnp.arctan2(Y, X)
    return jnp.sin(R * 2.0 * jnp.pi) * jnp.cos(Theta * 3.0)


def make_tables():
    def dftmat(n):
        k = jnp.arange(n, dtype=jnp.float32)
        ang = -2.0 * jnp.pi * jnp.outer(k, k) / n
        return jnp.cos(ang), jnp.sin(ang)

    fhr, fhi = dftmat(FH)
    fwr, fwi = dftmat(FW)
    kr = jnp.kron(fhr, fwr) - jnp.kron(fhi, fwi)       # Re(Fh kron Fw)
    ki = jnp.kron(fhr, fwi) + jnp.kron(fhi, fwr)       # Im(Fh kron Fw)

    # (w+1)^-1.5 along the FW axis of index p = h*FW + w, folded into the
    # forward table columns; 1/(FH*FW) folded into the inverse tables.
    sw = jnp.arange(1, FW + 1, dtype=jnp.float32) ** -1.5
    fsc = jnp.tile(sw, (FH,))[None, :]                            # (1, FIELD)
    fwd_dft = jnp.concatenate([kr * fsc, ki * fsc], axis=1)       # (FIELD, 2F)
    inv_nm = 1.0 / float(FIELD)
    inv_r = jnp.concatenate([kr, ki], axis=0) * inv_nm            # (2F, FIELD)
    inv_i = jnp.concatenate([-ki, kr], axis=0) * inv_nm           # (2F, FIELD)

    # Head masks tiled along the sublane axis: rows [h*M, (h+1)*M) == mask_h.
    head_id = jnp.arange(DIM, dtype=jnp.int32) // DH
    hmask_small = (head_id[None, :] == jnp.arange(NUM_HEADS)[:, None]
                   ).astype(jnp.float32)                          # (H, DIM)
    head_mask = jnp.repeat(hmask_small, M, axis=0)                # (H*M, DIM)

    # Block-diagonal batch bias, tiled once per head.
    batch_id = jnp.repeat(jnp.arange(B, dtype=jnp.int32), L)
    bb = jnp.where(batch_id[:, None] == batch_id[None, :],
                   0.0, -1e30).astype(jnp.float32)                # (M, M)
    batch_bias = jnp.tile(bb, (NUM_HEADS, 1))                     # (H*M, M)

    return dict(fwd_dft=fwd_dft.astype(jnp.bfloat16),
                inv_dft_r=inv_r.astype(jnp.bfloat16),
                inv_dft_i=inv_i.astype(jnp.bfloat16),
                head_mask=head_mask, batch_bias=batch_bias)


def init_params(key):
    ks = jax.random.split(key, 6)
    bf16 = jnp.bfloat16

    def rnd(k, shape, scale, dtype=jnp.float32):
        return (scale * jax.random.normal(k, shape)).astype(dtype)

    # All FractalNeuralOperator.transform instances are the identical
    # deterministic matrix in the reference, so one shared copy is exact.
    ft = fractal_transform_init(DIM).astype(bf16)

    # Tiny bias / LayerNorm vectors packed into one lane-dense (16,128) slab.
    slab = jnp.zeros((SLAB_ROWS, SLAB_LANES), jnp.float32)
    slab = slab.at[ROW_FEB, :FIELD].set(jnp.zeros((FIELD,), jnp.float32))
    slab = slab.at[ROW_FPB, :DIM].set(jnp.zeros((DIM,), jnp.float32))
    slab = slab.at[ROW_AOB:ROW_AOB + N_ATTN, :DIM].set(
        jnp.zeros((N_ATTN, DIM), jnp.float32))
    slab = slab.at[ROW_BNW:ROW_BNW + DEPTH, :DIM].set(
        jnp.ones((DEPTH, DIM), jnp.float32))
    slab = slab.at[ROW_BNB:ROW_BNB + DEPTH, :DIM].set(
        jnp.zeros((DEPTH, DIM), jnp.float32))
    slab = slab.at[ROW_NW, :DIM].set(jnp.ones((DIM,), jnp.float32))
    slab = slab.at[ROW_NB, :DIM].set(jnp.zeros((DIM,), jnp.float32))

    return dict(
        tok_emb=rnd(ks[0], (VOCAB, DIM), 1.0),
        pos_emb=rnd(ks[1], (MAX_SEQ, DIM), 1.0),
        field_emb_w=rnd(ks[2], (DIM, FIELD), 1.0 / math.sqrt(DIM), bf16),
        field_proj_w=rnd(ks[3], (FIELD, DIM), 1.0 / math.sqrt(FIELD), bf16),
        fractal_transform=ft,
        attn_out_w=rnd(ks[4], (N_ATTN * DIM, DIM), 1.0 / math.sqrt(DIM), bf16),
        out_w=rnd(ks[5], (DIM, VOCAB), 1.0 / math.sqrt(DIM), bf16),
        bias_slab=slab,
    )


# ----------------------------- driver -----------------------------------------
if __name__ == "__main__":
    key = jax.random.PRNGKey(0)
    pkey, tkey = jax.random.split(key)
    params = init_params(pkey)
    tables = make_tables()
    tokens = jax.random.randint(tkey, (B, L), 0, VOCAB, dtype=jnp.int32)

    logits = jax.jit(fractal_llm_forward)(tokens, params, tables)
    logits = jax.block_until_ready(logits)

    assert logits.shape == (B, L, VOCAB)
    assert bool(jnp.all(jnp.isfinite(logits)))
    print("KERNEL_OK")
</pallas_src>

<mosaic_0001>
module attributes {stable_mosaic.version = 11 : i64} {
  func.func @_fractal_llm_kernel(%arg0: memref<16x32xf32, #tpu.memory_space<vmem>>, %arg1: memref<32x64xbf16, #tpu.memory_space<vmem>>, %arg2: memref<64x128xbf16, #tpu.memory_space<vmem>>, %arg3: memref<128x64xbf16, #tpu.memory_space<vmem>>, %arg4: memref<128x64xbf16, #tpu.memory_space<vmem>>, %arg5: memref<64x32xbf16, #tpu.memory_space<vmem>>, %arg6: memref<32x32xbf16, #tpu.memory_space<vmem>>, %arg7: memref<64x32xf32, #tpu.memory_space<vmem>>, %arg8: memref<64x16xf32, #tpu.memory_space<vmem>>, %arg9: memref<128x32xbf16, #tpu.memory_space<vmem>>, %arg10: memref<16x128xf32, #tpu.memory_space<vmem>>, %arg11: memref<32x128xbf16, #tpu.memory_space<vmem>>, %arg12: memref<16x128xf32, #tpu.memory_space<vmem>>) attributes {dimension_semantics = [], scalar_prefetch = 0 : i64, scratch_operands = 0 : i64, tpu.core_type = #tpu.core_type<tc>} {
    %c0 = arith.constant 0 : index
    %c0_0 = arith.constant 0 : index
    %0 = vector.load %arg0[%c0, %c0_0] : memref<16x32xf32, #tpu.memory_space<vmem>>, vector<16x32xf32>
    %c0_1 = arith.constant 0 : index
    %c0_2 = arith.constant 0 : index
    %1 = vector.load %arg1[%c0_1, %c0_2] : memref<32x64xbf16, #tpu.memory_space<vmem>>, vector<32x64xbf16>
    %c0_3 = arith.constant 0 : index
    %c0_4 = arith.constant 0 : index
    %2 = vector.load %arg2[%c0_3, %c0_4] : memref<64x128xbf16, #tpu.memory_space<vmem>>, vector<64x128xbf16>
    %c0_5 = arith.constant 0 : index
    %c0_6 = arith.constant 0 : index
    %3 = vector.load %arg3[%c0_5, %c0_6] : memref<128x64xbf16, #tpu.memory_space<vmem>>, vector<128x64xbf16>
    %c0_7 = arith.constant 0 : index
    %c0_8 = arith.constant 0 : index
    %4 = vector.load %arg4[%c0_7, %c0_8] : memref<128x64xbf16, #tpu.memory_space<vmem>>, vector<128x64xbf16>
    %c0_9 = arith.constant 0 : index
    %c0_10 = arith.constant 0 : index
    %5 = vector.load %arg5[%c0_9, %c0_10] : memref<64x32xbf16, #tpu.memory_space<vmem>>, vector<64x32xbf16>
    %c0_11 = arith.constant 0 : index
    %c0_12 = arith.constant 0 : index
    %6 = vector.load %arg6[%c0_11, %c0_12] : memref<32x32xbf16, #tpu.memory_space<vmem>>, vector<32x32xbf16>
    %c0_13 = arith.constant 0 : index
    %c0_14 = arith.constant 0 : index
    %7 = vector.load %arg7[%c0_13, %c0_14] : memref<64x32xf32, #tpu.memory_space<vmem>>, vector<64x32xf32>
    %c0_15 = arith.constant 0 : index
    %c0_16 = arith.constant 0 : index
    %8 = vector.load %arg8[%c0_15, %c0_16] : memref<64x16xf32, #tpu.memory_space<vmem>>, vector<64x16xf32>
    %c0_17 = arith.constant 0 : index
    %c0_18 = arith.constant 0 : index
    %9 = vector.load %arg9[%c0_17, %c0_18] : memref<128x32xbf16, #tpu.memory_space<vmem>>, vector<128x32xbf16>
    %c0_19 = arith.constant 0 : index
    %c0_20 = arith.constant 0 : index
    %10 = vector.load %arg10[%c0_19, %c0_20] : memref<16x128xf32, #tpu.memory_space<vmem>>, vector<16x128xf32>
    %c0_21 = arith.constant 0 : index
    %c0_22 = arith.constant 0 : index
    %11 = vector.load %arg11[%c0_21, %c0_22] : memref<32x128xbf16, #tpu.memory_space<vmem>>, vector<32x128xbf16>
    %12 = vector.extract_strided_slice %10 {offsets = [0, 0], sizes = [1, 64], strides = [1, 1]} : vector<16x128xf32> to vector<1x64xf32>
    %13 = vector.extract_strided_slice %10 {offsets = [1, 0], sizes = [1, 32], strides = [1, 1]} : vector<16x128xf32> to vector<1x32xf32>
    %14 = vector.shape_cast %13 : vector<1x32xf32> to vector<1x32xf32>
    %15 = vector.broadcast %14 : vector<1x32xf32> to vector<16x32xf32>
    %16 = arith.truncf %0 : vector<16x32xf32> to vector<16x32xbf16>
    %cst = arith.constant dense<0.000000e+00> : vector<16x64xf32>
    %17 = tpu.matmul %16, %1, %cst {dimension_numbers = #tpu.dot_dimension_numbers<[1], [0], [0], [1], [0, 0, 1, 1], [], []>} : vector<16x32xbf16>, vector<32x64xbf16>, vector<16x64xf32> -> vector<16x64xf32>
    %18 = vector.broadcast %12 : vector<1x64xf32> to vector<16x64xf32>
    %19 = arith.addf %17, %18 : vector<16x64xf32>
    %20 = arith.truncf %19 : vector<16x64xf32> to vector<16x64xbf16>
    %cst_23 = arith.constant dense<0.000000e+00> : vector<16x128xf32>
    %21 = tpu.matmul %20, %2, %cst_23 {dimension_numbers = #tpu.dot_dimension_numbers<[1], [0], [0], [1], [0, 0, 1, 1], [], []>} : vector<16x64xbf16>, vector<64x128xbf16>, vector<16x128xf32> -> vector<16x128xf32>
    %22 = arith.mulf %21, %21 : vector<16x128xf32>
    %c64_i32 = arith.constant 64 : i32
    %23 = tpu.dynamic_rotate %22 by %c64_i32 dim 1 : vector<16x128xf32>, i32 -> vector<16x128xf32>
    %24 = arith.addf %22, %23 : vector<16x128xf32>
    %25 = math.sqrt %24 : vector<16x128xf32>
    %cst_24 = arith.constant 1.000000e+00 : f32
    %26 = vector.broadcast %cst_24 : f32 to vector<16x128xf32>
    %27 = arith.addf %26, %25 : vector<16x128xf32>
    %28 = arith.mulf %21, %27 : vector<16x128xf32>
    %29 = arith.truncf %28 : vector<16x128xf32> to vector<16x128xbf16>
    %cst_25 = arith.constant dense<0.000000e+00> : vector<16x64xf32>
    %30 = tpu.matmul %29, %3, %cst_25 {dimension_numbers = #tpu.dot_dimension_numbers<[1], [0], [0], [1], [0, 0, 1, 1], [], []>} : vector<16x128xbf16>, vector<128x64xbf16>, vector<16x64xf32> -> vector<16x64xf32>
    %31 = arith.truncf %28 : vector<16x128xf32> to vector<16x128xbf16>
    %cst_26 = arith.constant dense<0.000000e+00> : vector<16x64xf32>
    %32 = tpu.matmul %31, %4, %cst_26 {dimension_numbers = #tpu.dot_dimension_numbers<[1], [0], [0], [1], [0, 0, 1, 1], [], []>} : vector<16x128xbf16>, vector<128x64xbf16>, vector<16x64xf32> -> vector<16x64xf32>
    %33 = arith.mulf %30, %30 : vector<16x64xf32>
    %34 = arith.mulf %32, %32 : vector<16x64xf32>
    %35 = arith.addf %33, %34 : vector<16x64xf32>
    %36 = math.sqrt %35 : vector<16x64xf32>
    %37 = arith.truncf %36 : vector<16x64xf32> to vector<16x64xbf16>
    %cst_27 = arith.constant dense<0.000000e+00> : vector<16x32xf32>
    %38 = tpu.matmul %37, %5, %cst_27 {dimension_numbers = #tpu.dot_dimension_numbers<[1], [0], [0], [1], [0, 0, 1, 1], [], []>} : vector<16x64xbf16>, vector<64x32xbf16>, vector<16x32xf32> -> vector<16x32xf32>
    %39 = arith.addf %38, %15 : vector<16x32xf32>
    %40 = arith.addf %0, %39 : vector<16x32xf32>
    %41 = arith.truncf %40 : vector<16x32xf32> to vector<16x32xbf16>
    %cst_28 = arith.constant dense<0.000000e+00> : vector<16x32xf32>
    %42 = tpu.matmul %41, %6, %cst_28 {dimension_numbers = #tpu.dot_dimension_numbers<[1], [0], [0], [1], [0, 0, 1, 1], [], []>} : vector<16x32xbf16>, vector<32x32xbf16>, vector<16x32xf32> -> vector<16x32xf32>
    %43 = vector.extract_strided_slice %9 {offsets = [0, 0], sizes = [32, 32], strides = [1, 1]} : vector<128x32xbf16> to vector<32x32xbf16>
    %44 = vector.extract_strided_slice %10 {offsets = [2, 0], sizes = [1, 32], strides = [1, 1]} : vector<16x128xf32> to vector<1x32xf32>
    %45 = arith.truncf %42 : vector<16x32xf32> to vector<16x32xbf16>
    %cst_29 = arith.constant dense<0.000000e+00> : vector<16x32xf32>
    %46 = tpu.matmul %45, %6, %cst_29 {dimension_numbers = #tpu.dot_dimension_numbers<[1], [0], [0], [1], [0, 0, 1, 1], [], []>} : vector<16x32xbf16>, vector<32x32xbf16>, vector<16x32xf32> -> vector<16x32xf32>
    %47 = arith.truncf %46 : vector<16x32xf32> to vector<16x32xbf16>
    %48 = tpu.concatenate %46, %46, %46, %46 in 0 : vector<16x32xf32>, vector<16x32xf32>, vector<16x32xf32>, vector<16x32xf32> -> vector<64x32xf32>
    %49 = arith.mulf %48, %7 : vector<64x32xf32>
    %50 = arith.truncf %49 : vector<64x32xf32> to vector<64x32xbf16>
    %cst_30 = arith.constant dense<0.000000e+00> : vector<64x16xf32>
    %51 = tpu.matmul %50, %47, %cst_30 {dimension_numbers = #tpu.dot_dimension_numbers<[1], [1], [0], [0], [0, 0, 1, 0], [], []>} : vector<64x32xbf16>, vector<16x32xbf16>, vector<64x16xf32> -> vector<64x16xf32>
    %cst_31 = arith.constant 0.353553385 : f32
    %52 = vector.broadcast %cst_31 : f32 to vector<64x16xf32>
    %53 = arith.mulf %51, %52 : vector<64x16xf32>
    %54 = arith.addf %53, %8 : vector<64x16xf32>
    %cst_32 = arith.constant dense<0xFF800000> : vector<64xf32>
    %55 = vector.multi_reduction <maximumf>, %54, %cst_32 [1] : vector<64x16xf32> to vector<64xf32>
    %56 = vector.shape_cast %55 : vector<64xf32> to vector<64x1xf32>
    %57 = vector.broadcast %56 : vector<64x1xf32> to vector<64x16xf32>
    %58 = arith.subf %54, %57 : vector<64x16xf32>
    %59 = math.exp %58 : vector<64x16xf32>
    %cst_33 = arith.constant dense<0.000000e+00> : vector<64xf32>
    %60 = vector.multi_reduction <add>, %59, %cst_33 [1] : vector<64x16xf32> to vector<64xf32>
    %61 = vector.shape_cast %60 : vector<64xf32> to vector<64x1xf32>
    %62 = tpu.reciprocal %61 {approx = true} : vector<64x1xf32> -> vector<64x1xf32>
    %63 = vector.broadcast %62 : vector<64x1xf32> to vector<64x16xf32>
    %64 = arith.mulf %59, %63 : vector<64x16xf32>
    %65 = arith.truncf %64 : vector<64x16xf32> to vector<64x16xbf16>
    %66 = vector.extract_strided_slice %65 {offsets = [0, 0], sizes = [16, 16], strides = [1, 1]} : vector<64x16xbf16> to vector<16x16xbf16>
    %67 = vector.extract_strided_slice %50 {offsets = [0, 0], sizes = [16, 32], strides = [1, 1]} : vector<64x32xbf16> to vector<16x32xbf16>
    %cst_34 = arith.constant dense<0.000000e+00> : vector<16x32xf32>
    %68 = tpu.matmul %66, %67, %cst_34 {dimension_numbers = #tpu.dot_dimension_numbers<[1], [0], [0], [1], [0, 0, 1, 1], [], []>} : vector<16x16xbf16>, vector<16x32xbf16>, vector<16x32xf32> -> vector<16x32xf32>
    %69 = vector.extract_strided_slice %65 {offsets = [16, 0], sizes = [16, 16], strides = [1, 1]} : vector<64x16xbf16> to vector<16x16xbf16>
    %70 = vector.extract_strided_slice %50 {offsets = [16, 0], sizes = [16, 32], strides = [1, 1]} : vector<64x32xbf16> to vector<16x32xbf16>
    %cst_35 = arith.constant dense<0.000000e+00> : vector<16x32xf32>
    %71 = tpu.matmul %69, %70, %cst_35 {dimension_numbers = #tpu.dot_dimension_numbers<[1], [0], [0], [1], [0, 0, 1, 1], [], []>} : vector<16x16xbf16>, vector<16x32xbf16>, vector<16x32xf32> -> vector<16x32xf32>
    %72 = arith.addf %68, %71 : vector<16x32xf32>
    %73 = vector.extract_strided_slice %65 {offsets = [32, 0], sizes = [16, 16], strides = [1, 1]} : vector<64x16xbf16> to vector<16x16xbf16>
    %74 = vector.extract_strided_slice %50 {offsets = [32, 0], sizes = [16, 32], strides = [1, 1]} : vector<64x32xbf16> to vector<16x32xbf16>
    %cst_36 = arith.constant dense<0.000000e+00> : vector<16x32xf32>
    %75 = tpu.matmul %73, %74, %cst_36 {dimension_numbers = #tpu.dot_dimension_numbers<[1], [0], [0], [1], [0, 0, 1, 1], [], []>} : vector<16x16xbf16>, vector<16x32xbf16>, vector<16x32xf32> -> vector<16x32xf32>
    %76 = arith.addf %72, %75 : vector<16x32xf32>
    %77 = vector.extract_strided_slice %65 {offsets = [48, 0], sizes = [16, 16], strides = [1, 1]} : vector<64x16xbf16> to vector<16x16xbf16>
    %78 = vector.extract_strided_slice %50 {offsets = [48, 0], sizes = [16, 32], strides = [1, 1]} : vector<64x32xbf16> to vector<16x32xbf16>
    %cst_37 = arith.constant dense<0.000000e+00> : vector<16x32xf32>
    %79 = tpu.matmul %77, %78, %cst_37 {dimension_numbers = #tpu.dot_dimension_numbers<[1], [0], [0], [1], [0, 0, 1, 1], [], []>} : vector<16x16xbf16>, vector<16x32xbf16>, vector<16x32xf32> -> vector<16x32xf32>
    %80 = arith.addf %76, %79 : vector<16x32xf32>
    %81 = arith.truncf %80 : vector<16x32xf32> to vector<16x32xbf16>
    %cst_38 = arith.constant dense<0.000000e+00> : vector<16x32xf32>
    %82 = tpu.matmul %81, %43, %cst_38 {dimension_numbers = #tpu.dot_dimension_numbers<[1], [0], [0], [1], [0, 0, 1, 1], [], []>} : vector<16x32xbf16>, vector<32x32xbf16>, vector<16x32xf32> -> vector<16x32xf32>
    %83 = vector.broadcast %44 : vector<1x32xf32> to vector<16x32xf32>
    %84 = arith.addf %82, %83 : vector<16x32xf32>
    %85 = vector.extract_strided_slice %9 {offsets = [32, 0], sizes = [32, 32], strides = [1, 1]} : vector<128x32xbf16> to vector<32x32xbf16>
    %86 = vector.extract_strided_slice %10 {offsets = [3, 0], sizes = [1, 32], strides = [1, 1]} : vector<16x128xf32> to vector<1x32xf32>
    %87 = arith.truncf %84 : vector<16x32xf32> to vector<16x32xbf16>
    %cst_39 = arith.constant dense<0.000000e+00> : vector<16x32xf32>
    %88 = tpu.matmul %87, %6, %cst_39 {dimension_numbers = #tpu.dot_dimension_numbers<[1], [0], [0], [1], [0, 0, 1, 1], [], []>} : vector<16x32xbf16>, vector<32x32xbf16>, vector<16x32xf32> -> vector<16x32xf32>
    %89 = arith.truncf %88 : vector<16x32xf32> to vector<16x32xbf16>
    %90 = tpu.concatenate %88, %88, %88, %88 in 0 : vector<16x32xf32>, vector<16x32xf32>, vector<16x32xf32>, vector<16x32xf32> -> vector<64x32xf32>
    %91 = arith.mulf %90, %7 : vector<64x32xf32>
    %92 = arith.truncf %91 : vector<64x32xf32> to vector<64x32xbf16>
    %cst_40 = arith.constant dense<0.000000e+00> : vector<64x16xf32>
    %93 = tpu.matmul %92, %89, %cst_40 {dimension_numbers = #tpu.dot_dimension_numbers<[1], [1], [0], [0], [0, 0, 1, 0], [], []>} : vector<64x32xbf16>, vector<16x32xbf16>, vector<64x16xf32> -> vector<64x16xf32>
    %cst_41 = arith.constant 0.353553385 : f32
    %94 = vector.broadcast %cst_41 : f32 to vector<64x16xf32>
    %95 = arith.mulf %93, %94 : vector<64x16xf32>
    %96 = arith.addf %95, %8 : vector<64x16xf32>
    %cst_42 = arith.constant dense<0xFF800000> : vector<64xf32>
    %97 = vector.multi_reduction <maximumf>, %96, %cst_42 [1] : vector<64x16xf32> to vector<64xf32>
    %98 = vector.shape_cast %97 : vector<64xf32> to vector<64x1xf32>
    %99 = vector.broadcast %98 : vector<64x1xf32> to vector<64x16xf32>
    %100 = arith.subf %96, %99 : vector<64x16xf32>
    %101 = math.exp %100 : vector<64x16xf32>
    %cst_43 = arith.constant dense<0.000000e+00> : vector<64xf32>
    %102 = vector.multi_reduction <add>, %101, %cst_43 [1] : vector<64x16xf32> to vector<64xf32>
    %103 = vector.shape_cast %102 : vector<64xf32> to vector<64x1xf32>
    %104 = tpu.reciprocal %103 {approx = true} : vector<64x1xf32> -> vector<64x1xf32>
    %105 = vector.broadcast %104 : vector<64x1xf32> to vector<64x16xf32>
    %106 = arith.mulf %101, %105 : vector<64x16xf32>
    %107 = arith.truncf %106 : vector<64x16xf32> to vector<64x16xbf16>
    %108 = vector.extract_strided_slice %107 {offsets = [0, 0], sizes = [16, 16], strides = [1, 1]} : vector<64x16xbf16> to vector<16x16xbf16>
    %109 = vector.extract_strided_slice %92 {offsets = [0, 0], sizes = [16, 32], strides = [1, 1]} : vector<64x32xbf16> to vector<16x32xbf16>
    %cst_44 = arith.constant dense<0.000000e+00> : vector<16x32xf32>
    %110 = tpu.matmul %108, %109, %cst_44 {dimension_numbers = #tpu.dot_dimension_numbers<[1], [0], [0], [1], [0, 0, 1, 1], [], []>} : vector<16x16xbf16>, vector<16x32xbf16>, vector<16x32xf32> -> vector<16x32xf32>
    %111 = vector.extract_strided_slice %107 {offsets = [16, 0], sizes = [16, 16], strides = [1, 1]} : vector<64x16xbf16> to vector<16x16xbf16>
    %112 = vector.extract_strided_slice %92 {offsets = [16, 0], sizes = [16, 32], strides = [1, 1]} : vector<64x32xbf16> to vector<16x32xbf16>
    %cst_45 = arith.constant dense<0.000000e+00> : vector<16x32xf32>
    %113 = tpu.matmul %111, %112, %cst_45 {dimension_numbers = #tpu.dot_dimension_numbers<[1], [0], [0], [1], [0, 0, 1, 1], [], []>} : vector<16x16xbf16>, vector<16x32xbf16>, vector<16x32xf32> -> vector<16x32xf32>
    %114 = arith.addf %110, %113 : vector<16x32xf32>
    %115 = vector.extract_strided_slice %107 {offsets = [32, 0], sizes = [16, 16], strides = [1, 1]} : vector<64x16xbf16> to vector<16x16xbf16>
    %116 = vector.extract_strided_slice %92 {offsets = [32, 0], sizes = [16, 32], strides = [1, 1]} : vector<64x32xbf16> to vector<16x32xbf16>
    %cst_46 = arith.constant dense<0.000000e+00> : vector<16x32xf32>
    %117 = tpu.matmul %115, %116, %cst_46 {dimension_numbers = #tpu.dot_dimension_numbers<[1], [0], [0], [1], [0, 0, 1, 1], [], []>} : vector<16x16xbf16>, vector<16x32xbf16>, vector<16x32xf32> -> vector<16x32xf32>
    %118 = arith.addf %114, %117 : vector<16x32xf32>
    %119 = vector.extract_strided_slice %107 {offsets = [48, 0], sizes = [16, 16], strides = [1, 1]} : vector<64x16xbf16> to vector<16x16xbf16>
    %120 = vector.extract_strided_slice %92 {offsets = [48, 0], sizes = [16, 32], strides = [1, 1]} : vector<64x32xbf16> to vector<16x32xbf16>
    %cst_47 = arith.constant dense<0.000000e+00> : vector<16x32xf32>
    %121 = tpu.matmul %119, %120, %cst_47 {dimension_numbers = #tpu.dot_dimension_numbers<[1], [0], [0], [1], [0, 0, 1, 1], [], []>} : vector<16x16xbf16>, vector<16x32xbf16>, vector<16x32xf32> -> vector<16x32xf32>
    %122 = arith.addf %118, %121 : vector<16x32xf32>
    %123 = arith.truncf %122 : vector<16x32xf32> to vector<16x32xbf16>
    %cst_48 = arith.constant dense<0.000000e+00> : vector<16x32xf32>
    %124 = tpu.matmul %123, %85, %cst_48 {dimension_numbers = #tpu.dot_dimension_numbers<[1], [0], [0], [1], [0, 0, 1, 1], [], []>} : vector<16x32xbf16>, vector<32x32xbf16>, vector<16x32xf32> -> vector<16x32xf32>
    %125 = vector.broadcast %86 : vector<1x32xf32> to vector<16x32xf32>
    %126 = arith.addf %124, %125 : vector<16x32xf32>
    %127 = vector.extract_strided_slice %10 {offsets = [6, 0], sizes = [1, 32], strides = [1, 1]} : vector<16x128xf32> to vector<1x32xf32>
    %128 = vector.extract_strided_slice %10 {offsets = [8, 0], sizes = [1, 32], strides = [1, 1]} : vector<16x128xf32> to vector<1x32xf32>
    %cst_49 = arith.constant dense<0.000000e+00> : vector<16xf32>
    %129 = vector.multi_reduction <add>, %126, %cst_49 [1] : vector<16x32xf32> to vector<16xf32>
    %130 = vector.shape_cast %129 : vector<16xf32> to vector<16x1xf32>
    %cst_50 = arith.constant 3.200000e+01 : f32
    %131 = vector.broadcast %cst_50 : f32 to vector<16x1xf32>
    %132 = arith.divf %130, %131 : vector<16x1xf32>
    %133 = vector.broadcast %132 : vector<16x1xf32> to vector<16x32xf32>
    %134 = arith.subf %126, %133 : vector<16x32xf32>
    %135 = arith.mulf %134, %134 : vector<16x32xf32>
    %cst_51 = arith.constant dense<0.000000e+00> : vector<16xf32>
    %136 = vector.multi_reduction <add>, %135, %cst_51 [1] : vector<16x32xf32> to vector<16xf32>
    %137 = vector.shape_cast %136 : vector<16xf32> to vector<16x1xf32>
    %cst_52 = arith.constant 3.200000e+01 : f32
    %138 = vector.broadcast %cst_52 : f32 to vector<16x1xf32>
    %139 = arith.divf %137, %138 : vector<16x1xf32>
    %cst_53 = arith.constant 9.99999974E-6 : f32
    %140 = vector.broadcast %cst_53 : f32 to vector<16x1xf32>
    %141 = arith.addf %139, %140 : vector<16x1xf32>
    %142 = math.rsqrt %141 : vector<16x1xf32>
    %143 = vector.broadcast %142 : vector<16x1xf32> to vector<16x32xf32>
    %144 = arith.mulf %134, %143 : vector<16x32xf32>
    %145 = vector.broadcast %127 : vector<1x32xf32> to vector<16x32xf32>
    %146 = arith.mulf %144, %145 : vector<16x32xf32>
    %147 = vector.broadcast %128 : vector<1x32xf32> to vector<16x32xf32>
    %148 = arith.addf %146, %147 : vector<16x32xf32>
    %149 = arith.truncf %36 : vector<16x64xf32> to vector<16x64xbf16>
    %cst_54 = arith.constant dense<0.000000e+00> : vector<16x128xf32>
    %150 = tpu.matmul %149, %2, %cst_54 {dimension_numbers = #tpu.dot_dimension_numbers<[1], [0], [0], [1], [0, 0, 1, 1], [], []>} : vector<16x64xbf16>, vector<64x128xbf16>, vector<16x128xf32> -> vector<16x128xf32>
    %151 = arith.mulf %150, %150 : vector<16x128xf32>
    %c64_i32_55 = arith.constant 64 : i32
    %152 = tpu.dynamic_rotate %151 by %c64_i32_55 dim 1 : vector<16x128xf32>, i32 -> vector<16x128xf32>
    %153 = arith.addf %151, %152 : vector<16x128xf32>
    %154 = math.sqrt %153 : vector<16x128xf32>
    %cst_56 = arith.constant 1.000000e+00 : f32
    %155 = vector.broadcast %cst_56 : f32 to vector<16x128xf32>
    %156 = arith.addf %155, %154 : vector<16x128xf32>
    %157 = arith.mulf %150, %156 : vector<16x128xf32>
    %158 = arith.truncf %157 : vector<16x128xf32> to vector<16x128xbf16>
    %cst_57 = arith.constant dense<0.000000e+00> : vector<16x64xf32>
    %159 = tpu.matmul %158, %3, %cst_57 {dimension_numbers = #tpu.dot_dimension_numbers<[1], [0], [0], [1], [0, 0, 1, 1], [], []>} : vector<16x128xbf16>, vector<128x64xbf16>, vector<16x64xf32> -> vector<16x64xf32>
    %160 = arith.truncf %157 : vector<16x128xf32> to vector<16x128xbf16>
    %cst_58 = arith.constant dense<0.000000e+00> : vector<16x64xf32>
    %161 = tpu.matmul %160, %4, %cst_58 {dimension_numbers = #tpu.dot_dimension_numbers<[1], [0], [0], [1], [0, 0, 1, 1], [], []>} : vector<16x128xbf16>, vector<128x64xbf16>, vector<16x64xf32> -> vector<16x64xf32>
    %162 = arith.mulf %159, %159 : vector<16x64xf32>
    %163 = arith.mulf %161, %161 : vector<16x64xf32>
    %164 = arith.addf %162, %163 : vector<16x64xf32>
    %165 = math.sqrt %164 : vector<16x64xf32>
    %166 = arith.truncf %165 : vector<16x64xf32> to vector<16x64xbf16>
    %cst_59 = arith.constant dense<0.000000e+00> : vector<16x32xf32>
    %167 = tpu.matmul %166, %5, %cst_59 {dimension_numbers = #tpu.dot_dimension_numbers<[1], [0], [0], [1], [0, 0, 1, 1], [], []>} : vector<16x64xbf16>, vector<64x32xbf16>, vector<16x32xf32> -> vector<16x32xf32>
    %168 = arith.addf %167, %15 : vector<16x32xf32>
    %169 = arith.addf %148, %168 : vector<16x32xf32>
    %170 = arith.truncf %169 : vector<16x32xf32> to vector<16x32xbf16>
    %cst_60 = arith.constant dense<0.000000e+00> : vector<16x32xf32>
    %171 = tpu.matmul %170, %6, %cst_60 {dimension_numbers = #tpu.dot_dimension_numbers<[1], [0], [0], [1], [0, 0, 1, 1], [], []>} : vector<16x32xbf16>, vector<32x32xbf16>, vector<16x32xf32> -> vector<16x32xf32>
    %172 = vector.extract_strided_slice %9 {offsets = [64, 0], sizes = [32, 32], strides = [1, 1]} : vector<128x32xbf16> to vector<32x32xbf16>
    %173 = vector.extract_strided_slice %10 {offsets = [4, 0], sizes = [1, 32], strides = [1, 1]} : vector<16x128xf32> to vector<1x32xf32>
    %174 = arith.truncf %171 : vector<16x32xf32> to vector<16x32xbf16>
    %cst_61 = arith.constant dense<0.000000e+00> : vector<16x32xf32>
    %175 = tpu.matmul %174, %6, %cst_61 {dimension_numbers = #tpu.dot_dimension_numbers<[1], [0], [0], [1], [0, 0, 1, 1], [], []>} : vector<16x32xbf16>, vector<32x32xbf16>, vector<16x32xf32> -> vector<16x32xf32>
    %176 = arith.truncf %175 : vector<16x32xf32> to vector<16x32xbf16>
    %177 = tpu.concatenate %175, %175, %175, %175 in 0 : vector<16x32xf32>, vector<16x32xf32>, vector<16x32xf32>, vector<16x32xf32> -> vector<64x32xf32>
    %178 = arith.mulf %177, %7 : vector<64x32xf32>
    %179 = arith.truncf %178 : vector<64x32xf32> to vector<64x32xbf16>
    %cst_62 = arith.constant dense<0.000000e+00> : vector<64x16xf32>
    %180 = tpu.matmul %179, %176, %cst_62 {dimension_numbers = #tpu.dot_dimension_numbers<[1], [1], [0], [0], [0, 0, 1, 0], [], []>} : vector<64x32xbf16>, vector<16x32xbf16>, vector<64x16xf32> -> vector<64x16xf32>
    %cst_63 = arith.constant 0.353553385 : f32
    %181 = vector.broadcast %cst_63 : f32 to vector<64x16xf32>
    %182 = arith.mulf %180, %181 : vector<64x16xf32>
    %183 = arith.addf %182, %8 : vector<64x16xf32>
    %cst_64 = arith.constant dense<0xFF800000> : vector<64xf32>
    %184 = vector.multi_reduction <maximumf>, %183, %cst_64 [1] : vector<64x16xf32> to vector<64xf32>
    %185 = vector.shape_cast %184 : vector<64xf32> to vector<64x1xf32>
    %186 = vector.broadcast %185 : vector<64x1xf32> to vector<64x16xf32>
    %187 = arith.subf %183, %186 : vector<64x16xf32>
    %188 = math.exp %187 : vector<64x16xf32>
    %cst_65 = arith.constant dense<0.000000e+00> : vector<64xf32>
    %189 = vector.multi_reduction <add>, %188, %cst_65 [1] : vector<64x16xf32> to vector<64xf32>
    %190 = vector.shape_cast %189 : vector<64xf32> to vector<64x1xf32>
    %191 = tpu.reciprocal %190 {approx = true} : vector<64x1xf32> -> vector<64x1xf32>
    %192 = vector.broadcast %191 : vector<64x1xf32> to vector<64x16xf32>
    %193 = arith.mulf %188, %192 : vector<64x16xf32>
    %194 = arith.truncf %193 : vector<64x16xf32> to vector<64x16xbf16>
    %195 = vector.extract_strided_slice %194 {offsets = [0, 0], sizes = [16, 16], strides = [1, 1]} : vector<64x16xbf16> to vector<16x16xbf16>
    %196 = vector.extract_strided_slice %179 {offsets = [0, 0], sizes = [16, 32], strides = [1, 1]} : vector<64x32xbf16> to vector<16x32xbf16>
    %cst_66 = arith.constant dense<0.000000e+00> : vector<16x32xf32>
    %197 = tpu.matmul %195, %196, %cst_66 {dimension_numbers = #tpu.dot_dimension_numbers<[1], [0], [0], [1], [0, 0, 1, 1], [], []>} : vector<16x16xbf16>, vector<16x32xbf16>, vector<16x32xf32> -> vector<16x32xf32>
    %198 = vector.extract_strided_slice %194 {offsets = [16, 0], sizes = [16, 16], strides = [1, 1]} : vector<64x16xbf16> to vector<16x16xbf16>
    %199 = vector.extract_strided_slice %179 {offsets = [16, 0], sizes = [16, 32], strides = [1, 1]} : vector<64x32xbf16> to vector<16x32xbf16>
    %cst_67 = arith.constant dense<0.000000e+00> : vector<16x32xf32>
    %200 = tpu.matmul %198, %199, %cst_67 {dimension_numbers = #tpu.dot_dimension_numbers<[1], [0], [0], [1], [0, 0, 1, 1], [], []>} : vector<16x16xbf16>, vector<16x32xbf16>, vector<16x32xf32> -> vector<16x32xf32>
    %201 = arith.addf %197, %200 : vector<16x32xf32>
    %202 = vector.extract_strided_slice %194 {offsets = [32, 0], sizes = [16, 16], strides = [1, 1]} : vector<64x16xbf16> to vector<16x16xbf16>
    %203 = vector.extract_strided_slice %179 {offsets = [32, 0], sizes = [16, 32], strides = [1, 1]} : vector<64x32xbf16> to vector<16x32xbf16>
    %cst_68 = arith.constant dense<0.000000e+00> : vector<16x32xf32>
    %204 = tpu.matmul %202, %203, %cst_68 {dimension_numbers = #tpu.dot_dimension_numbers<[1], [0], [0], [1], [0, 0, 1, 1], [], []>} : vector<16x16xbf16>, vector<16x32xbf16>, vector<16x32xf32> -> vector<16x32xf32>
    %205 = arith.addf %201, %204 : vector<16x32xf32>
    %206 = vector.extract_strided_slice %194 {offsets = [48, 0], sizes = [16, 16], strides = [1, 1]} : vector<64x16xbf16> to vector<16x16xbf16>
    %207 = vector.extract_strided_slice %179 {offsets = [48, 0], sizes = [16, 32], strides = [1, 1]} : vector<64x32xbf16> to vector<16x32xbf16>
    %cst_69 = arith.constant dense<0.000000e+00> : vector<16x32xf32>
    %208 = tpu.matmul %206, %207, %cst_69 {dimension_numbers = #tpu.dot_dimension_numbers<[1], [0], [0], [1], [0, 0, 1, 1], [], []>} : vector<16x16xbf16>, vector<16x32xbf16>, vector<16x32xf32> -> vector<16x32xf32>
    %209 = arith.addf %205, %208 : vector<16x32xf32>
    %210 = arith.truncf %209 : vector<16x32xf32> to vector<16x32xbf16>
    %cst_70 = arith.constant dense<0.000000e+00> : vector<16x32xf32>
    %211 = tpu.matmul %210, %172, %cst_70 {dimension_numbers = #tpu.dot_dimension_numbers<[1], [0], [0], [1], [0, 0, 1, 1], [], []>} : vector<16x32xbf16>, vector<32x32xbf16>, vector<16x32xf32> -> vector<16x32xf32>
    %212 = vector.broadcast %173 : vector<1x32xf32> to vector<16x32xf32>
    %213 = arith.addf %211, %212 : vector<16x32xf32>
    %214 = vector.extract_strided_slice %9 {offsets = [96, 0], sizes = [32, 32], strides = [1, 1]} : vector<128x32xbf16> to vector<32x32xbf16>
    %215 = vector.extract_strided_slice %10 {offsets = [5, 0], sizes = [1, 32], strides = [1, 1]} : vector<16x128xf32> to vector<1x32xf32>
    %216 = arith.truncf %213 : vector<16x32xf32> to vector<16x32xbf16>
    %cst_71 = arith.constant dense<0.000000e+00> : vector<16x32xf32>
    %217 = tpu.matmul %216, %6, %cst_71 {dimension_numbers = #tpu.dot_dimension_numbers<[1], [0], [0], [1], [0, 0, 1, 1], [], []>} : vector<16x32xbf16>, vector<32x32xbf16>, vector<16x32xf32> -> vector<16x32xf32>
    %218 = arith.truncf %217 : vector<16x32xf32> to vector<16x32xbf16>
    %219 = tpu.concatenate %217, %217, %217, %217 in 0 : vector<16x32xf32>, vector<16x32xf32>, vector<16x32xf32>, vector<16x32xf32> -> vector<64x32xf32>
    %220 = arith.mulf %219, %7 : vector<64x32xf32>
    %221 = arith.truncf %220 : vector<64x32xf32> to vector<64x32xbf16>
    %cst_72 = arith.constant dense<0.000000e+00> : vector<64x16xf32>
    %222 = tpu.matmul %221, %218, %cst_72 {dimension_numbers = #tpu.dot_dimension_numbers<[1], [1], [0], [0], [0, 0, 1, 0], [], []>} : vector<64x32xbf16>, vector<16x32xbf16>, vector<64x16xf32> -> vector<64x16xf32>
    %cst_73 = arith.constant 0.353553385 : f32
    %223 = vector.broadcast %cst_73 : f32 to vector<64x16xf32>
    %224 = arith.mulf %222, %223 : vector<64x16xf32>
    %225 = arith.addf %224, %8 : vector<64x16xf32>
    %cst_74 = arith.constant dense<0xFF800000> : vector<64xf32>
    %226 = vector.multi_reduction <maximumf>, %225, %cst_74 [1] : vector<64x16xf32> to vector<64xf32>
    %227 = vector.shape_cast %226 : vector<64xf32> to vector<64x1xf32>
    %228 = vector.broadcast %227 : vector<64x1xf32> to vector<64x16xf32>
    %229 = arith.subf %225, %228 : vector<64x16xf32>
    %230 = math.exp %229 : vector<64x16xf32>
    %cst_75 = arith.constant dense<0.000000e+00> : vector<64xf32>
    %231 = vector.multi_reduction <add>, %230, %cst_75 [1] : vector<64x16xf32> to vector<64xf32>
    %232 = vector.shape_cast %231 : vector<64xf32> to vector<64x1xf32>
    %233 = tpu.reciprocal %232 {approx = true} : vector<64x1xf32> -> vector<64x1xf32>
    %234 = vector.broadcast %233 : vector<64x1xf32> to vector<64x16xf32>
    %235 = arith.mulf %230, %234 : vector<64x16xf32>
    %236 = arith.truncf %235 : vector<64x16xf32> to vector<64x16xbf16>
    %237 = vector.extract_strided_slice %236 {offsets = [0, 0], sizes = [16, 16], strides = [1, 1]} : vector<64x16xbf16> to vector<16x16xbf16>
    %238 = vector.extract_strided_slice %221 {offsets = [0, 0], sizes = [16, 32], strides = [1, 1]} : vector<64x32xbf16> to vector<16x32xbf16>
    %cst_76 = arith.constant dense<0.000000e+00> : vector<16x32xf32>
    %239 = tpu.matmul %237, %238, %cst_76 {dimension_numbers = #tpu.dot_dimension_numbers<[1], [0], [0], [1], [0, 0, 1, 1], [], []>} : vector<16x16xbf16>, vector<16x32xbf16>, vector<16x32xf32> -> vector<16x32xf32>
    %240 = vector.extract_strided_slice %236 {offsets = [16, 0], sizes = [16, 16], strides = [1, 1]} : vector<64x16xbf16> to vector<16x16xbf16>
    %241 = vector.extract_strided_slice %221 {offsets = [16, 0], sizes = [16, 32], strides = [1, 1]} : vector<64x32xbf16> to vector<16x32xbf16>
    %cst_77 = arith.constant dense<0.000000e+00> : vector<16x32xf32>
    %242 = tpu.matmul %240, %241, %cst_77 {dimension_numbers = #tpu.dot_dimension_numbers<[1], [0], [0], [1], [0, 0, 1, 1], [], []>} : vector<16x16xbf16>, vector<16x32xbf16>, vector<16x32xf32> -> vector<16x32xf32>
    %243 = arith.addf %239, %242 : vector<16x32xf32>
    %244 = vector.extract_strided_slice %236 {offsets = [32, 0], sizes = [16, 16], strides = [1, 1]} : vector<64x16xbf16> to vector<16x16xbf16>
    %245 = vector.extract_strided_slice %221 {offsets = [32, 0], sizes = [16, 32], strides = [1, 1]} : vector<64x32xbf16> to vector<16x32xbf16>
    %cst_78 = arith.constant dense<0.000000e+00> : vector<16x32xf32>
    %246 = tpu.matmul %244, %245, %cst_78 {dimension_numbers = #tpu.dot_dimension_numbers<[1], [0], [0], [1], [0, 0, 1, 1], [], []>} : vector<16x16xbf16>, vector<16x32xbf16>, vector<16x32xf32> -> vector<16x32xf32>
    %247 = arith.addf %243, %246 : vector<16x32xf32>
    %248 = vector.extract_strided_slice %236 {offsets = [48, 0], sizes = [16, 16], strides = [1, 1]} : vector<64x16xbf16> to vector<16x16xbf16>
    %249 = vector.extract_strided_slice %221 {offsets = [48, 0], sizes = [16, 32], strides = [1, 1]} : vector<64x32xbf16> to vector<16x32xbf16>
    %cst_79 = arith.constant dense<0.000000e+00> : vector<16x32xf32>
    %250 = tpu.matmul %248, %249, %cst_79 {dimension_numbers = #tpu.dot_dimension_numbers<[1], [0], [0], [1], [0, 0, 1, 1], [], []>} : vector<16x16xbf16>, vector<16x32xbf16>, vector<16x32xf32> -> vector<16x32xf32>
    %251 = arith.addf %247, %250 : vector<16x32xf32>
    %252 = arith.truncf %251 : vector<16x32xf32> to vector<16x32xbf16>
    %cst_80 = arith.constant dense<0.000000e+00> : vector<16x32xf32>
    %253 = tpu.matmul %252, %214, %cst_80 {dimension_numbers = #tpu.dot_dimension_numbers<[1], [0], [0], [1], [0, 0, 1, 1], [], []>} : vector<16x32xbf16>, vector<32x32xbf16>, vector<16x32xf32> -> vector<16x32xf32>
    %254 = vector.broadcast %215 : vector<1x32xf32> to vector<16x32xf32>
    %255 = arith.addf %253, %254 : vector<16x32xf32>
    %256 = vector.extract_strided_slice %10 {offsets = [7, 0], sizes = [1, 32], strides = [1, 1]} : vector<16x128xf32> to vector<1x32xf32>
    %257 = vector.extract_strided_slice %10 {offsets = [9, 0], sizes = [1, 32], strides = [1, 1]} : vector<16x128xf32> to vector<1x32xf32>
    %cst_81 = arith.constant dense<0.000000e+00> : vector<16xf32>
    %258 = vector.multi_reduction <add>, %255, %cst_81 [1] : vector<16x32xf32> to vector<16xf32>
    %259 = vector.shape_cast %258 : vector<16xf32> to vector<16x1xf32>
    %cst_82 = arith.constant 3.200000e+01 : f32
    %260 = vector.broadcast %cst_82 : f32 to vector<16x1xf32>
    %261 = arith.divf %259, %260 : vector<16x1xf32>
    %262 = vector.broadcast %261 : vector<16x1xf32> to vector<16x32xf32>
    %263 = arith.subf %255, %262 : vector<16x32xf32>
    %264 = arith.mulf %263, %263 : vector<16x32xf32>
    %cst_83 = arith.constant dense<0.000000e+00> : vector<16xf32>
    %265 = vector.multi_reduction <add>, %264, %cst_83 [1] : vector<16x32xf32> to vector<16xf32>
    %266 = vector.shape_cast %265 : vector<16xf32> to vector<16x1xf32>
    %cst_84 = arith.constant 3.200000e+01 : f32
    %267 = vector.broadcast %cst_84 : f32 to vector<16x1xf32>
    %268 = arith.divf %266, %267 : vector<16x1xf32>
    %cst_85 = arith.constant 9.99999974E-6 : f32
    %269 = vector.broadcast %cst_85 : f32 to vector<16x1xf32>
    %270 = arith.addf %268, %269 : vector<16x1xf32>
    %271 = math.rsqrt %270 : vector<16x1xf32>
    %272 = vector.broadcast %271 : vector<16x1xf32> to vector<16x32xf32>
    %273 = arith.mulf %263, %272 : vector<16x32xf32>
    %274 = vector.broadcast %256 : vector<1x32xf32> to vector<16x32xf32>
    %275 = arith.mulf %273, %274 : vector<16x32xf32>
    %276 = vector.broadcast %257 : vector<1x32xf32> to vector<16x32xf32>
    %277 = arith.addf %275, %276 : vector<16x32xf32>
    %278 = vector.extract_strided_slice %10 {offsets = [10, 0], sizes = [1, 32], strides = [1, 1]} : vector<16x128xf32> to vector<1x32xf32>
    %279 = vector.extract_strided_slice %10 {offsets = [11, 0], sizes = [1, 32], strides = [1, 1]} : vector<16x128xf32> to vector<1x32xf32>
    %cst_86 = arith.constant dense<0.000000e+00> : vector<16xf32>
    %280 = vector.multi_reduction <add>, %277, %cst_86 [1] : vector<16x32xf32> to vector<16xf32>
    %281 = vector.shape_cast %280 : vector<16xf32> to vector<16x1xf32>
    %cst_87 = arith.constant 3.200000e+01 : f32
    %282 = vector.broadcast %cst_87 : f32 to vector<16x1xf32>
    %283 = arith.divf %281, %282 : vector<16x1xf32>
    %284 = vector.broadcast %283 : vector<16x1xf32> to vector<16x32xf32>
    %285 = arith.subf %277, %284 : vector<16x32xf32>
    %286 = arith.mulf %285, %285 : vector<16x32xf32>
    %cst_88 = arith.constant dense<0.000000e+00> : vector<16xf32>
    %287 = vector.multi_reduction <add>, %286, %cst_88 [1] : vector<16x32xf32> to vector<16xf32>
    %288 = vector.shape_cast %287 : vector<16xf32> to vector<16x1xf32>
    %cst_89 = arith.constant 3.200000e+01 : f32
    %289 = vector.broadcast %cst_89 : f32 to vector<16x1xf32>
    %290 = arith.divf %288, %289 : vector<16x1xf32>
    %cst_90 = arith.constant 9.99999974E-6 : f32
    %291 = vector.broadcast %cst_90 : f32 to vector<16x1xf32>
    %292 = arith.addf %290, %291 : vector<16x1xf32>
    %293 = math.rsqrt %292 : vector<16x1xf32>
    %294 = vector.broadcast %293 : vector<16x1xf32> to vector<16x32xf32>
    %295 = arith.mulf %285, %294 : vector<16x32xf32>
    %296 = vector.broadcast %278 : vector<1x32xf32> to vector<16x32xf32>
    %297 = arith.mulf %295, %296 : vector<16x32xf32>
    %298 = vector.broadcast %279 : vector<1x32xf32> to vector<16x32xf32>
    %299 = arith.addf %297, %298 : vector<16x32xf32>
    %300 = arith.truncf %299 : vector<16x32xf32> to vector<16x32xbf16>
    %cst_91 = arith.constant dense<0.000000e+00> : vector<16x128xf32>
    %301 = tpu.matmul %300, %11, %cst_91 {dimension_numbers = #tpu.dot_dimension_numbers<[1], [0], [0], [1], [0, 0, 1, 1], [], []>} : vector<16x32xbf16>, vector<32x128xbf16>, vector<16x128xf32> -> vector<16x128xf32>
    %c0_92 = arith.constant 0 : index
    %c0_93 = arith.constant 0 : index
    %302 = vector.load %arg12[%c0_92, %c0_93] : memref<16x128xf32, #tpu.memory_space<vmem>>, vector<16x128xf32>
    tpu.vector_store %arg12[%c0_92, %c0_93], %301 {strides = array<i32>} : memref<16x128xf32, #tpu.memory_space<vmem>>, vector<16x128xf32>,
    return
  }
}

</mosaic_0001>

<bundles_post_ra>
// kernel: fractal_llm_forward.1
= control target key start
LH: loop header
LB: loop body
LE: loop exit
PB: predicated region body
PF: predicated region fallthrough
CT: control target
= control target key end

     0   :  { %s3387_s0 = inlined_call_operand.vmem [shape: f32[16,32], index: 0, kind: input, shape index: {}]   ;;  %s3388_s1 = inlined_call_operand.vmem [shape: bf16[32,64], index: 1, kind: input, shape index: {}]   ;;  %s3389_s2 = inlined_call_operand.vmem [shape: bf16[64,128], index: 2, kind: input, shape index: {}]   ;;  %s3390_s3 = inlined_call_operand.vmem [shape: bf16[128,64], index: 3, kind: input, shape index: {}]   ;;  %s3391_s4 = inlined_call_operand.vmem [shape: bf16[128,64], index: 4, kind: input, shape index: {}]   ;;  %s3392_s5 = inlined_call_operand.vmem [shape: bf16[64,32], index: 5, kind: input, shape index: {}]   ;;  %s3393_s6 = inlined_call_operand.vmem [shape: bf16[32,32], index: 6, kind: input, shape index: {}]   ;;  %s3394_s7 = inlined_call_operand.vmem [shape: f32[64,32], index: 7, kind: input, shape index: {}]   ;;  %s3395_s8 = inlined_call_operand.vmem [shape: f32[64,16], index: 8, kind: input, shape index: {}]   ;;  %s3396_s9 = inlined_call_operand.vmem [shape: bf16[128,32], index: 9, kind: input, shape index: {}]   ;;  %s3397_s10 = inlined_call_operand.vmem [shape: f32[16,128], index: 10, kind: input, shape index: {}]   ;;  %s3398_s11 = inlined_call_operand.vmem [shape: bf16[32,128], index: 11, kind: input, shape index: {}]   ;;  %s3399_s12 = inlined_call_operand.hbm [shape: f32[16,128], index: 12, kind: output, shape index: {}]  }
   0x1   :  { %v2388_v0 = vld [vmem:[%s3388_s1 + $0x8] sm:$0xff]  ;;  %v2387_v1 = vld [vmem:[%s3388_s1] sm:$0xff]  ;;  %v2392_v2 = vld [vmem:[%s3389_s2 + $0x18] sm:$0xff] }
   0x2   :  { %164 = vmatpush.bf16.msra.mxu0 %v2388_v0  ;;  %v2737_v3 = vld [vmem:[%s3387_s0] sm:$0xff]  ;;  %v2742_v4 = vld [vmem:[%s3387_s0 + $0x8] sm:$0xff] }
   0x3   :  { %17 = vsyncpa [#allocation3], 0  ;;  %205 = vmatpush.bf16.msra.mxu3 %v2392_v2  ;;  %v140_v5 = vpack.c.bf16 %v2742_v4, %v2737_v3  ;;  %vm154_vm0 = vcmask 261120   ;;  %v2391_v6 = vld [vmem:[%s3389_s2 + $0x10] sm:$0xff]  ;;  %v2390_v7 = vld [vmem:[%s3389_s2 + $0x8] sm:$0xff]  ;;  %vm197_vm1 = vcmask 523264  }
   0x4   :  { %v2389_v8 = vld [vmem:[%s3389_s2] sm:$0xff]  ;;  %s2655_s19 = smov 64   ;;  %v2400_v20 = vld [vmem:[%s3390_s3 + $0x38] sm:$0xff]  ;;  %v2399_v22 = vld [vmem:[%s3390_s3 + $0x30] sm:$0xff]  ;;  %vm595_vm10 = vcmask 130048   ;;  %s2175_s24 = sshll.u32 %s3399_s12, 4  ;;  %s2176_s24 = int_to_ptr.hbm [resolvable:$true] %s2175_s24 }
   0x5   :  { %v2759_v10 = vld [vmem:[%s3397_s10] sm:$0xff]  ;;  %v2408_v21 = vld [vmem:[%s3391_s4 + $0x38] sm:$0xff]  ;;  %300 = vmatpush.bf16.msra.mxu2 %v2400_v20  ;;  %v2407_v23 = vld [vmem:[%s3391_s4 + $0x30] sm:$0xff]  ;;  %s2658_s25 = smov 128   ;;  %s2659_s26 = smov 8  }
   0x6   :  { %165 = vmatpush.bf16.msra.mxu0 %v2387_v1  ;;  %v141_v11 = vperm.slane %v2759_v10, 0  ;;  %v2398_v24 = vld [vmem:[%s3390_s3 + $0x28] sm:$0xff]  ;;  %v2397_v26 = vld [vmem:[%s3390_s3 + $0x20] sm:$0xff]  ;;  %v2396_v28 = vld [vmem:[%s3390_s3 + $0x18] sm:$0xff] }
   0x7   :  { %206 = vmatpush.bf16.msra.mxu3 %v2391_v6  ;;  %v2406_v25 = vld [vmem:[%s3391_s4 + $0x28] sm:$0xff]  ;;  %v2405_v27 = vld [vmem:[%s3391_s4 + $0x20] sm:$0xff]  ;;  %v2404_v29 = vld [vmem:[%s3391_s4 + $0x18] sm:$0xff] }
   0x8   :  { %v2395_v30 = vld [vmem:[%s3390_s3 + $0x10] sm:$0xff]  ;;  %v2394_v32 = vld [vmem:[%s3390_s3 + $0x8] sm:$0xff]  ;;  %v2393_v34 = vld [vmem:[%s3390_s3] sm:$0xff] }
   0x9   :  { %2195 = vmatmul.msk.bf16.vlgmr.msra.gmra.mxu0 %vm154_vm0, %v140_v5  ;;  %301 = vmatpush.bf16.msra.mxu2 %v2399_v22  ;;  %v2403_v31 = vld [vmem:[%s3391_s4 + $0x10] sm:$0xff]  ;;  %v2402_v33 = vld [vmem:[%s3391_s4 + $0x8] sm:$0xff]  ;;  %v2401_v35 = vld [vmem:[%s3391_s4] sm:$0xff] }
   0xa   :  { %v2826_v1 = vld [vmem:[%s3392_s5 + $0x18] sm:$0xff]  ;;  %v2832_v2 = vld [vmem:[%s3392_s5 + $0x10] sm:$0xff]  ;;  %v2838_v5 = vld [vmem:[%s3392_s5 + $0x8] sm:$0xff] }
   0xb   :  { %207 = vmatpush.bf16.msra.mxu3 %v2390_v7  ;;  %438 = vmatpush.bf16.msrb.mxu0 %v2826_v1  ;;  %v2844_v6 = vld [vmem:[%s3392_s5] sm:$0xff]  ;;  %s2657_s5 = smov [#allocation2]  }
   0xc   :  { %s2173_s22 = sshll.u32 %s2657_s5, 4  ;;  %s2174_s22 = int_to_ptr.vmem [resolvable:$true] %s2173_s22 }
   0xd   :  { %302 = vmatpush.bf16.msra.mxu2 %v2398_v24 }
   0xf   :  { %208 = vmatpush.bf16.msra.mxu3 %v2389_v8  ;;  %439 = vmatpush.bf16.msrb.mxu0 %v2832_v2 }
  0x11   :  { %303 = vmatpush.bf16.msra.mxu2 %v2397_v26 }
  0x13   :  { %362 = vmatpush.bf16.msrb.mxu3 %v2408_v21  ;;  %440 = vmatpush.bf16.msrb.mxu0 %v2838_v5 }
  0x15   :  { %304 = vmatpush.bf16.msra.mxu2 %v2396_v28 }
  0x17   :  { %363 = vmatpush.bf16.msrb.mxu3 %v2407_v23  ;;  %441 = vmatpush.bf16.msrb.mxu0 %v2844_v6 }
  0x19   :  { %305 = vmatpush.bf16.msra.mxu2 %v2395_v30 }
  0x1b   :  { %364 = vmatpush.bf16.msrb.mxu3 %v2406_v25 }
  0x1d   :  { %306 = vmatpush.bf16.msra.mxu2 %v2394_v32 }
  0x1f   :  { %365 = vmatpush.bf16.msrb.mxu3 %v2405_v27 }
  0x21   :  { %307 = vmatpush.bf16.msra.mxu2 %v2393_v34 }
  0x23   :  { %366 = vmatpush.bf16.msrb.mxu3 %v2404_v29 }
  0x27   :  { %367 = vmatpush.bf16.msrb.mxu3 %v2403_v31 }
  0x2b   :  { %368 = vmatpush.bf16.msrb.mxu3 %v2402_v33 }
  0x2f   :  { %369 = vmatpush.bf16.msrb.mxu3 %v2401_v35 }
  0x86   :  { %v167_v9 = vpop.f32.mrf.mxu0 }
  0x87   :  { %v168_v13 = vadd.f32 %v167_v9, %v141_v11 }
  0x8e   :  { %v169_v12 = vpop.f32.mrf.mxu0 }
  0x8f   :  { %v170_v14 = vadd.f32 %v169_v12, %v141_v11 }
  0x91   :  { %v172_v15 = vpack.c.bf16 %v170_v14, %v168_v13 }
  0x93   :  { %2212 = vmatmul.msk.bf16.vlgmr.msra.gmra.mxu3 %vm197_vm1, %v172_v15 }
 0x116   :  { %v2763_v16 = vpop.f32.mrf.mxu3 }
 0x117   :  { %v215_v17 = vmul.f32 %v2763_v16, %v2763_v16 }
 0x119   :  { %217 = vrot.lane.b32.xlu0 %v215_v17, %s2655_s19 }
 0x11e   :  { %v2768_v18 = vpop.f32.mrf.mxu3 }
 0x11f   :  { %v216_v19 = vmul.f32 %v2768_v18, %v2768_v18 }
 0x121   :  { %219 = vrot.lane.b32.xlu0 %v216_v19, %s2655_s19 }
 0x18b   :  { %v218_v36 = vpop.permute.xlu0 %217 }
 0x18c   :  { %v221_v37 = vadd.f32 %v218_v36, %v215_v17 }
 0x18e   :  { %2430 = vrsqrt.f32 %v221_v37  ;;  %vm230_vm2 = vcmp.eq.f32.partialorder %v221_v37, inf  ;;  %v233_v53 = vand.u32 2147483648, %v221_v37  ;;  %vm232_vm3 = vcmp.eq.f32.partialorder %v221_v37, 0.0 }
 0x193   :  { %v220_v38 = vpop.permute.xlu0 %219 }
 0x194   :  { %v2431_v39 = vpop.eup %2430  ;;  %v222_v40 = vadd.f32 %v220_v38, %v216_v19 }
 0x195   :  { %v224_v41 = vmul.f32 %v2431_v39, %v221_v37 }
 0x196   :  { %2432 = vrsqrt.f32 %v222_v40  ;;  %vm242_vm4 = vcmp.eq.f32.partialorder %v222_v40, inf  ;;  %v245_v57 = vand.u32 2147483648, %v222_v40  ;;  %vm244_vm5 = vcmp.eq.f32.partialorder %v222_v40, 0.0 }
 0x197   :  { %v225_v42 = vmul.f32 %v2431_v39, %v224_v41 }
 0x199   :  { %v226_v43 = vmul.f32 0.5, %v225_v42  ;;  %v2866_v42 = vperm.slane %v2759_v10, 1 }
 0x19b   :  { %v227_v44 = vsub.f32 1.5, %v226_v43 }
 0x19c   :  { %v2433_v45 = vpop.eup %2432 }
 0x19d   :  { %v228_v46 = vmul.f32 %v2431_v39, %v227_v44  ;;  %v236_v47 = vmul.f32 %v2433_v45, %v222_v40  ;;  %v2854_v39 = vld [vmem:[%s3393_s6 + $0x8] sm:$0xff] }
 0x19e   :  { %472 = vmatpush.bf16.msra.mxu1 %v2854_v39  ;;  %490 = vmatpush.bf16.msra.mxu0 %v2854_v39 }
 0x19f   :  { %v229_v48 = vmul.f32 %v228_v46, %v221_v37  ;;  %v237_v49 = vmul.f32 %v2433_v45, %v236_v47 }
 0x1a1   :  { %v238_v50 = vmul.f32 0.5, %v237_v49  ;;  %v231_v51 = vsel %vm230_vm2, %v221_v37, %v229_v48 }
 0x1a2   :  { %v234_v55 = vsel %vm232_vm3, %v233_v53, %v231_v51  ;;  %v2877_v53 = vld [vmem:[%s3394_s7] sm:$0xff] }
 0x1a3   :  { %v239_v52 = vsub.f32 1.5, %v238_v50  ;;  %v247_v59 = vadd.f32 1.0, %v234_v55 }
 0x1a5   :  { %v240_v54 = vmul.f32 %v2433_v45, %v239_v52  ;;  %v249_v62 = vmul.f32 %v247_v59, %v2763_v16  ;;  %v2905_v59 = vld [vmem:[%s3394_s7 + $0x28] sm:$0xff] }
 0x1a7   :  { %v241_v56 = vmul.f32 %v240_v54, %v222_v40  ;;  %v2892_v54 = vld [vmem:[%s3394_s7 + $0x10] sm:$0xff] }
 0x1a9   :  { %v243_v58 = vsel %vm242_vm4, %v222_v40, %v241_v56  ;;  %v2861_v40 = vld [vmem:[%s3393_s6] sm:$0xff] }
 0x1aa   :  { %v246_v60 = vsel %vm244_vm5, %v245_v57, %v243_v58  ;;  %473 = vmatpush.bf16.msra.mxu1 %v2861_v40  ;;  %491 = vmatpush.bf16.msra.mxu0 %v2861_v40  ;;  %v2900_v58 = vld [vmem:[%s3394_s7 + $0x8] sm:$0xff] }
 0x1ab   :  { %v248_v61 = vadd.f32 1.0, %v246_v60  ;;  %v2910_v60 = vld [vmem:[%s3394_s7 + $0x38] sm:$0xff] }
 0x1ad   :  { %v250_v63 = vmul.f32 %v248_v61, %v2768_v18 }
 0x1af   :  { %v251_v0 = vpack.c.bf16 %v250_v63, %v249_v62  ;;  %v2916_v62 = vld [vmem:[%s3394_s7 + $0x18] sm:$0xff] }
 0x1b1   :  { %308 = vmatmul.bf16.vlgmr.msra.gmra.mxu2 %v251_v0  ;;  %370 = vmatmul.bf16.vlgmr.msrb.gmra.mxu3 %v251_v0 }
 0x234   :  { %v309_v7 = vpop.f32.mrf.mxu2  ;;  %v371_v8 = vpop.f32.mrf.mxu3 }
 0x235   :  { %v376_v9 = vmul.f32 %v309_v7, %v309_v7  ;;  %v378_v11 = vmul.f32 %v371_v8, %v371_v8 }
 0x237   :  { %v380_v12 = vadd.f32 %v378_v11, %v376_v9 }
 0x239   :  { %2434 = vrsqrt.f32 %v380_v12  ;;  %vm389_vm6 = vcmp.eq.f32.partialorder %v380_v12, inf  ;;  %v392_v33 = vand.u32 2147483648, %v380_v12  ;;  %vm391_vm8 = vcmp.eq.f32.partialorder %v380_v12, 0.0 }
 0x23c   :  { %v311_v13 = vpop.f32.mrf.mxu2  ;;  %v373_v14 = vpop.f32.mrf.mxu3 }
 0x23d   :  { %v377_v15 = vmul.f32 %v311_v13, %v311_v13  ;;  %v379_v16 = vmul.f32 %v373_v14, %v373_v14 }
 0x23f   :  { %v2435_v17 = vpop.eup %2434  ;;  %v381_v18 = vadd.f32 %v379_v16, %v377_v15 }
 0x240   :  { %v383_v19 = vmul.f32 %v2435_v17, %v380_v12 }
 0x241   :  { %2436 = vrsqrt.f32 %v381_v18  ;;  %vm401_vm7 = vcmp.eq.f32.partialorder %v381_v18, inf  ;;  %v404_v34 = vand.u32 2147483648, %v381_v18  ;;  %vm403_vm9 = vcmp.eq.f32.partialorder %v381_v18, 0.0 }
 0x242   :  { %v384_v20 = vmul.f32 %v2435_v17, %v383_v19 }
 0x244   :  { %v385_v21 = vmul.f32 0.5, %v384_v20 }
 0x246   :  { %v386_v22 = vsub.f32 1.5, %v385_v21 }
 0x247   :  { %v2437_v23 = vpop.eup %2436 }
 0x248   :  { %v395_v24 = vmul.f32 %v2437_v23, %v381_v18  ;;  %v387_v25 = vmul.f32 %v2435_v17, %v386_v22 }
 0x24a   :  { %v396_v26 = vmul.f32 %v2437_v23, %v395_v24  ;;  %v388_v28 = vmul.f32 %v387_v25, %v380_v12 }
 0x24c   :  { %v397_v27 = vmul.f32 0.5, %v396_v26  ;;  %v390_v31 = vsel %vm389_vm6, %v380_v12, %v388_v28 }
 0x24d   :  { %v393_v36 = vsel %vm391_vm8, %v392_v33, %v390_v31 }
 0x24e   :  { %v398_v29 = vsub.f32 1.5, %v397_v27 }
 0x250   :  { %v399_v30 = vmul.f32 %v2437_v23, %v398_v29 }
 0x252   :  { %v400_v32 = vmul.f32 %v399_v30, %v381_v18 }
 0x254   :  { %v402_v35 = vsel %vm401_vm7, %v381_v18, %v400_v32 }
 0x255   :  { %v405_v37 = vsel %vm403_vm9, %v404_v34, %v402_v35  ;;  %v2932_v34 = vld [vmem:[%s3395_s8] sm:$0xff] }
 0x256   :  { %v2847_v38 = vpack.c.bf16 %v405_v37, %v393_v36 }
 0x258   :  { %2293 = vmatmul.msk.bf16.vlgmr.msrb.gmra.mxu0 %vm197_vm1, %v2847_v38 }
 0x2d5   :  { %v443_v41 = vpop.f32.mrf.mxu0 }
 0x2d6   :  { %v444_v43 = vadd.f32 %v443_v41, %v2866_v42 }
 0x2d8   :  { %v448_v46 = vadd.f32 %v444_v43, %v2737_v3  ;;  %v2882_v3 = vld [vmem:[%s3394_s7 + $0x20] sm:$0xff]  ;;  %v2939_v43 = vld [vmem:[%s3395_s8 + $0x8] sm:$0xff] }
 0x2dd   :  { %v445_v44 = vpop.f32.mrf.mxu0 }
 0x2de   :  { %v446_v45 = vadd.f32 %v445_v44, %v2866_v42 }
 0x2e0   :  { %v449_v47 = vadd.f32 %v446_v45, %v2742_v4  ;;  %v2887_v4 = vld [vmem:[%s3394_s7 + $0x30] sm:$0xff] }
 0x2e2   :  { %v450_v48 = vpack.c.bf16 %v449_v47, %v448_v46 }
 0x2e4   :  { %2302 = vmatmul.msk.bf16.vlgmr.msra.gmra.mxu1 %vm154_vm0, %v450_v48  ;;  %v2946_v48 = vld [vmem:[%s3395_s8 + $0x10] sm:$0xff] }
 0x361   :  { %v475_v49 = vpop.f32.mrf.mxu1 }
 0x369   :  { %v477_v50 = vpop.f32.mrf.mxu1 }
 0x36a   :  { %v480_v51 = vpack.c.bf16 %v477_v50, %v475_v49 }
 0x36c   :  { %2303 = vmatmul.msk.bf16.vlgmr.msra.gmra.mxu0 %vm154_vm0, %v480_v51 }
 0x3e9   :  { %v493_v52 = vpop.f32.mrf.mxu0 }
 0x3ea   :  { %v499_v55 = vmul.f32 %v493_v52, %v2877_v53  ;;  %v503_v56 = vmul.f32 %v493_v52, %v2882_v3  ;;  %v505_v57 = vmul.f32 %v493_v52, %v2887_v4  ;;  %v501_v61 = vmul.f32 %v493_v52, %v2892_v54 }
 0x3ec   :  { %v507_v63 = vpack.c.bf16 %v499_v55, %v499_v55  ;;  %v511_v0 = vpack.c.bf16 %v503_v56, %v503_v56  ;;  %v513_v7 = vpack.c.bf16 %v505_v57, %v505_v57  ;;  %v509_v15 = vpack.c.bf16 %v501_v61, %v501_v61  ;;  %v2953_v55 = vld [vmem:[%s3395_s8 + $0x18] sm:$0xff] }
 0x3ee   :  { %v523_v21 = vunpack.c.l.b16 %v507_v63  ;;  %v527_v22 = vunpack.c.l.b16 %v511_v0  ;;  %v529_v25 = vunpack.c.l.b16 %v513_v7  ;;  %v525_v27 = vunpack.c.l.b16 %v509_v15  ;;  %v2960_v0 = vld [vmem:[%s3395_s8 + $0x20] sm:$0xff] }
 0x3f1   :  { %v495_v8 = vpop.f32.mrf.mxu0 }
 0x3f2   :  { %v500_v9 = vmul.f32 %v495_v8, %v2900_v58  ;;  %v504_v11 = vmul.f32 %v495_v8, %v2905_v59  ;;  %v506_v12 = vmul.f32 %v495_v8, %v2910_v60  ;;  %v498_v13 = vpack.c.bf16 %v495_v8, %v493_v52 }
 0x3f3   :  { %v502_v14 = vmul.f32 %v495_v8, %v2916_v62 }
 0x3f4   :  { %v508_v16 = vpack.c.bf16 %v500_v9, %v500_v9  ;;  %v512_v17 = vpack.c.bf16 %v504_v11, %v504_v11  ;;  %v514_v18 = vpack.c.bf16 %v506_v12, %v506_v12  ;;  %v548_v19 = vsel %vm154_vm0, %v498_v13, 0  ;;  %v2967_v13 = vld [vmem:[%s3395_s8 + $0x30] sm:$0xff] }
 0x3f5   :  { %557 = vmatpush.bf16.xpose.msrb.mxu1 %v548_v19  ;;  %v510_v20 = vpack.c.bf16 %v502_v14, %v502_v14 }
 0x3f6   :  { %v524_v23 = vunpack.c.l.b16 %v508_v16  ;;  %v528_v24 = vunpack.c.l.b16 %v512_v17  ;;  %v530_v26 = vunpack.c.l.b16 %v514_v18  ;;  %v2974_v18 = vld [vmem:[%s3395_s8 + $0x38] sm:$0xff] }
 0x3f7   :  { %v526_v28 = vunpack.c.l.b16 %v510_v20 }
 0x3f8   :  { %v531_v29 = vpack.c.b16 %v524_v23, %v523_v21  ;;  %v533_v30 = vpack.c.b16 %v528_v24, %v527_v22  ;;  %v534_v31 = vpack.c.b16 %v530_v26, %v529_v25  ;;  %v2981_v23 = vld [vmem:[%s3395_s8 + $0x28] sm:$0xff] }
 0x3f9   :  { %v532_v32 = vpack.c.b16 %v526_v28, %v525_v27 }
 0x3fa   :  { %731 = vmatpush.bf16.msra.mxu3 %v531_v29  ;;  %754 = vmatpush.bf16.msrb.mxu0 %v533_v30 }
 0x3fb   :  { %708 = vmatpush.bf16.msrb.mxu2 %v532_v32 }
 0x3fc   :  { %2304 = vmatmul.msk.bf16.vlgmr.msrb.gmra.mxu1 %vm154_vm0, %v531_v29 }
 0x3fe   :  { %829 = vmatpush.bf16.msra.mxu0 %v2854_v39 }
 0x3ff   :  { %779 = vmatpush.bf16.msra.mxu2 %v534_v31 }
 0x402   :  { %830 = vmatpush.bf16.msra.mxu0 %v2861_v40 }
 0x40c   :  { %2305 = vmatmul.msk.bf16.gmra.mxu1 %vm154_vm0, %v532_v32 }
 0x41c   :  { %2306 = vmatmul.msk.bf16.gmra.mxu1 %vm154_vm0, %v533_v30 }
 0x42c   :  { %2307 = vmatmul.msk.bf16.gmra.mxu1 %vm154_vm0, %v534_v31 }
 0x479   :  { %v559_v33 = vpop.f32.mrf.mxu1 }
 0x47a   :  { %v579_v35 = vmul.f32 0.35355338, %v559_v33 }
 0x47c   :  { %v587_v36 = vadd.f32 %v579_v35, %v2932_v34 }
 0x47e   :  { %v596_v37 = vsel %vm595_vm10, %v587_v36, -inf }
 0x47f   :  { %597 = vmax.xlane.f32.xlu2 %v596_v37 }
 0x481   :  { %v561_v41 = vpop.f32.mrf.mxu1 }
 0x482   :  { %v580_v44 = vmul.f32 0.35355338, %v561_v41 }
 0x484   :  { %v588_v45 = vadd.f32 %v580_v44, %v2939_v43 }
 0x486   :  { %v599_v46 = vsel %vm595_vm10, %v588_v45, -inf }
 0x487   :  { %600 = vmax.xlane.f32.xlu2 %v599_v46 }
 0x489   :  { %v564_v47 = vpop.f32.mrf.mxu1 }
 0x48a   :  { %v581_v49 = vmul.f32 0.35355338, %v564_v47 }
 0x48c   :  { %v589_v50 = vadd.f32 %v581_v49, %v2946_v48 }
 0x48e   :  { %v602_v51 = vsel %vm595_vm10, %v589_v50, -inf }
 0x48f   :  { %603 = vmax.xlane.f32.xlu1 %v602_v51 }
 0x491   :  { %v566_v52 = vpop.f32.mrf.mxu1 }
 0x492   :  { %v582_v56 = vmul.f32 0.35355338, %v566_v52 }
 0x494   :  { %v590_v57 = vadd.f32 %v582_v56, %v2953_v55 }
 0x496   :  { %v605_v61 = vsel %vm595_vm10, %v590_v57, -inf }
 0x497   :  { %606 = vmax.xlane.f32.xlu1 %v605_v61 }
 0x499   :  { %v569_v63 = vpop.f32.mrf.mxu1 }
 0x49a   :  { %v583_v7 = vmul.f32 0.35355338, %v569_v63 }
 0x49c   :  { %v591_v8 = vadd.f32 %v583_v7, %v2960_v0 }
 0x49e   :  { %v608_v9 = vsel %vm595_vm10, %v591_v8, -inf }
 0x49f   :  { %609 = vmax.xlane.f32.xlu2 %v608_v9 }
 0x4a1   :  { %v571_v11 = vpop.f32.mrf.mxu1 }
 0x4a2   :  { %v584_v21 = vmul.f32 0.35355338, %v571_v11 }
 0x4a4   :  { %v592_v24 = vadd.f32 %v584_v21, %v2981_v23 }
 0x4a6   :  { %v611_v25 = vsel %vm595_vm10, %v592_v24, -inf }
 0x4a9   :  { %v574_v12 = vpop.f32.mrf.mxu1 }
 0x4aa   :  { %v585_v14 = vmul.f32 0.35355338, %v574_v12 }
 0x4ac   :  { %v593_v15 = vadd.f32 %v585_v14, %v2967_v13 }
 0x4ae   :  { %v614_v16 = vsel %vm595_vm10, %v593_v15, -inf }
 0x4af   :  { %615 = vmax.xlane.f32.xlu0 %v614_v16 }
 0x4b1   :  { %v576_v17 = vpop.f32.mrf.mxu1 }
 0x4b2   :  { %v586_v19 = vmul.f32 0.35355338, %v576_v17 }
 0x4b4   :  { %v594_v20 = vadd.f32 %v586_v19, %v2974_v18 }
 0x4b6   :  { %v617_v22 = vsel %vm595_vm10, %v594_v20, -inf }
 0x4b7   :  { %618 = vmax.xlane.f32.xlu1 %v617_v22 }
 0x4bf   :  { %612 = vmax.xlane.f32.xlu1 %v611_v25 }
 0x4f2   :  { %v598_v26 = vpop.xlane.xlu2 %597 }
 0x4f3   :  { %v620_v29 = vsub.f32 %v587_v36, %v598_v26 }
 0x4f5   :  { %v628_v31 = vmul.f32 1.442695, %v620_v29 }
 0x4fa   :  { %v601_v32 = vpop.xlane.xlu2 %600 }
 0x4fb   :  { %v621_v41 = vsub.f32 %v588_v45, %v601_v32 }
 0x4fd   :  { %v630_v47 = vmul.f32 1.442695, %v621_v41 }
 0x502   :  { %v604_v27 = vpop.xlane.xlu1 %603 }
 0x503   :  { %v622_v28 = vsub.f32 %v589_v50, %v604_v27 }
 0x505   :  { %v632_v30 = vmul.f32 1.442695, %v622_v28 }
 0x507   :  { %2438 = vpow2.f32 %v632_v30 }
 0x508   :  { %2440 = vpow2.f32 %v628_v31 }
 0x50a   :  { %v607_v33 = vpop.xlane.xlu1 %606 }
 0x50b   :  { %v623_v35 = vsub.f32 %v590_v57, %v607_v33 }
 0x50d   :  { %v2439_v37 = vpop.eup %2438  ;;  %v634_v44 = vmul.f32 1.442695, %v623_v35 }
 0x50e   :  { %v650_v46 = vsel %vm595_vm10, %v2439_v37, 0.0  ;;  %v2441_v49 = vpop.eup %2440 }
 0x50f   :  { %2442 = vpow2.f32 %v634_v44  ;;  %651 = vadd.xlane.f32.xlu2 %v650_v46  ;;  %v644_v36 = vsel %vm595_vm10, %v2441_v49, 0.0 }
 0x510   :  { %2444 = vpow2.f32 %v630_v47 }
 0x512   :  { %v610_v45 = vpop.xlane.xlu2 %609 }
 0x513   :  { %v624_v63 = vsub.f32 %v591_v8, %v610_v45 }
 0x515   :  { %v2443_v51 = vpop.eup %2442  ;;  %v636_v9 = vmul.f32 1.442695, %v624_v63 }
 0x516   :  { %v653_v50 = vsel %vm595_vm10, %v2443_v51, 0.0  ;;  %v2445_v52 = vpop.eup %2444 }
 0x517   :  { %645 = vadd.xlane.f32.xlu2 %v644_v36  ;;  %654 = vadd.xlane.f32.xlu1 %v653_v50  ;;  %v647_v56 = vsel %vm595_vm10, %v2445_v52, 0.0 }
 0x51f   :  { %648 = vadd.xlane.f32.xlu1 %v647_v56 }
 0x522   :  { %v616_v57 = vpop.xlane.xlu0 %615 }
 0x523   :  { %v626_v61 = vsub.f32 %v593_v15, %v616_v57 }
 0x525   :  { %v640_v7 = vmul.f32 1.442695, %v626_v61 }
 0x527   :  { %2446 = vpow2.f32 %v640_v7 }
 0x528   :  { %2448 = vpow2.f32 %v636_v9 }
 0x52a   :  { %v619_v11 = vpop.xlane.xlu1 %618 }
 0x52b   :  { %v627_v12 = vsub.f32 %v594_v20, %v619_v11 }
 0x52d   :  { %v2447_v14 = vpop.eup %2446  ;;  %v642_v16 = vmul.f32 1.442695, %v627_v12 }
 0x52e   :  { %v662_v17 = vsel %vm595_vm10, %v2447_v14, 0.0  ;;  %v2449_v21 = vpop.eup %2448 }
 0x52f   :  { %2450 = vpow2.f32 %v642_v16  ;;  %663 = vadd.xlane.f32.xlu2 %v662_v17  ;;  %v656_v15 = vsel %vm595_vm10, %v2449_v21, 0.0 }
 0x532   :  { %v613_v19 = vpop.xlane.xlu1 %612 }
 0x533   :  { %v625_v22 = vsub.f32 %v592_v24, %v613_v19 }
 0x535   :  { %v2451_v25 = vpop.eup %2450  ;;  %v638_v26 = vmul.f32 1.442695, %v625_v22 }
 0x536   :  { %v665_v8 = vsel %vm595_vm10, %v2451_v25, 0.0 }
 0x537   :  { %2452 = vpow2.f32 %v638_v26  ;;  %657 = vadd.xlane.f32.xlu2 %v656_v15  ;;  %666 = vadd.xlane.f32.xlu1 %v665_v8 }
 0x53d   :  { %v2453_v20 = vpop.eup %2452 }
 0x53e   :  { %v659_v27 = vsel %vm595_vm10, %v2453_v20, 0.0 }
 0x53f   :  { %660 = vadd.xlane.f32.xlu1 %v659_v27 }
 0x582   :  { %v652_v28 = vpop.xlane.xlu2 %651 }
 0x583   :  { %2454 = vrcp.f32 %v652_v28 }
 0x589   :  { %v2455_v31 = vpop.eup %2454 }
 0x58a   :  { %v646_v29 = vpop.xlane.xlu2 %645  ;;  %v655_v30 = vpop.xlane.xlu1 %654  ;;  %v678_v24 = vmul.f32 %v2455_v31, %v2439_v37 }
 0x58b   :  { %2456 = vrcp.f32 %v655_v30 }
 0x58c   :  { %2458 = vrcp.f32 %v646_v29  ;;  %v686_v41 = vpack.c.bf16 %v678_v24, %v678_v24 }
 0x58e   :  { %v694_v36 = vunpack.c.l.b16 %v686_v41 }
 0x591   :  { %v2457_v32 = vpop.eup %2456 }
 0x592   :  { %v649_v33 = vpop.xlane.xlu1 %648  ;;  %v2459_v35 = vpop.eup %2458  ;;  %v679_v44 = vmul.f32 %v2457_v32, %v2443_v51 }
 0x593   :  { %2460 = vrcp.f32 %v649_v33  ;;  %v676_v47 = vmul.f32 %v2459_v35, %v2441_v49 }
 0x594   :  { %v687_v46 = vpack.c.bf16 %v679_v44, %v679_v44 }
 0x595   :  { %v684_v57 = vpack.c.bf16 %v676_v47, %v676_v47 }
 0x596   :  { %v695_v50 = vunpack.c.l.b16 %v687_v46 }
 0x597   :  { %v717_v7 = vunpack.c.l.b16 %v684_v57 }
 0x598   :  { %v696_v45 = vpack.c.b16 %v695_v50, %v694_v36 }
 0x599   :  { %v2461_v56 = vpop.eup %2460 }
 0x59a   :  { %v677_v61 = vmul.f32 %v2461_v56, %v2445_v52  ;;  %2308 = vmatmul.msk.bf16.vlgmr.msrb.gmra.mxu2 %vm595_vm10, %v696_v45 }
 0x59c   :  { %v685_v63 = vpack.c.bf16 %v677_v61, %v677_v61 }
 0x59e   :  { %v718_v9 = vunpack.c.l.b16 %v685_v63 }
 0x5a0   :  { %v719_v37 = vpack.c.b16 %v718_v9, %v717_v7 }
 0x5a2   :  { %v664_v11 = vpop.xlane.xlu2 %663  ;;  %2309 = vmatmul.msk.bf16.vlgmr.msra.gmra.mxu3 %vm595_vm10, %v719_v37 }
 0x5a3   :  { %2462 = vrcp.f32 %v664_v11 }
 0x5a9   :  { %v2463_v16 = vpop.eup %2462 }
 0x5aa   :  { %v658_v51 = vpop.xlane.xlu2 %657  ;;  %v667_v12 = vpop.xlane.xlu1 %666  ;;  %v682_v49 = vmul.f32 %v2463_v16, %v2447_v14 }
 0x5ab   :  { %2464 = vrcp.f32 %v667_v12 }
 0x5ac   :  { %2466 = vrcp.f32 %v658_v51  ;;  %v690_v52 = vpack.c.bf16 %v682_v49, %v682_v49  ;;  %v789_v51 = vperm.slane %v2759_v10, 2 }
 0x5ae   :  { %v765_v27 = vunpack.c.l.b16 %v690_v52 }
 0x5b1   :  { %v2465_v17 = vpop.eup %2464 }
 0x5b2   :  { %v661_v19 = vpop.xlane.xlu1 %660  ;;  %v2467_v22 = vpop.eup %2466  ;;  %v683_v26 = vmul.f32 %v2465_v17, %v2451_v25  ;;  %v2416_v25 = vld [vmem:[%s3396_s9 + $0x8] sm:$0xff] }
 0x5b3   :  { %2468 = vrcp.f32 %v661_v19  ;;  %v680_v8 = vmul.f32 %v2467_v22, %v2449_v21  ;;  %811 = vmatpush.bf16.msrb.mxu3 %v2416_v25  ;;  %v2415_v21 = vld [vmem:[%s3396_s9] sm:$0xff] }
 0x5b4   :  { %v691_v15 = vpack.c.bf16 %v683_v26, %v683_v26 }
 0x5b5   :  { %v688_v31 = vpack.c.bf16 %v680_v8, %v680_v8 }
 0x5b6   :  { %v766_v28 = vunpack.c.l.b16 %v691_v15 }
 0x5b7   :  { %v740_v33 = vunpack.c.l.b16 %v688_v31  ;;  %812 = vmatpush.bf16.msrb.mxu3 %v2415_v21 }
 0x5b8   :  { %v767_v30 = vpack.c.b16 %v766_v28, %v765_v27 }
 0x5b9   :  { %v2469_v29 = vpop.eup %2468 }
 0x5ba   :  { %v681_v24 = vmul.f32 %v2469_v29, %v2453_v20  ;;  %2311 = vmatmul.msk.bf16.vlgmr.msra.gmra.mxu2 %vm595_vm10, %v767_v30 }
 0x5bc   :  { %v689_v32 = vpack.c.bf16 %v681_v24, %v681_v24 }
 0x5be   :  { %v741_v35 = vunpack.c.l.b16 %v689_v32 }
 0x5c0   :  { %v742_v14 = vpack.c.b16 %v741_v35, %v740_v33 }
 0x5c2   :  { %2310 = vmatmul.msk.bf16.vlgmr.msrb.gmra.mxu0 %vm595_vm10, %v742_v14 }
 0x61d   :  { %v710_v41 = vpop.f32.mrf.mxu2 }
 0x625   :  { %v712_v20 = vpop.f32.mrf.mxu2  ;;  %v733_v44 = vpop.f32.mrf.mxu3 }
 0x626   :  { %v734_v50 = vadd.f32 %v733_v44, %v710_v41 }
 0x62d   :  { %v735_v36 = vpop.f32.mrf.mxu3 }
 0x62e   :  { %v736_v56 = vadd.f32 %v735_v36, %v712_v20 }
 0x63d   :  { %v781_v46 = vpop.f32.mrf.mxu2 }
 0x63f   :  { %v756_v47 = vpop.f32.mrf.mxu0 }
 0x640   :  { %v761_v45 = vadd.f32 %v756_v47, %v734_v50 }
 0x642   :  { %v786_v7 = vadd.f32 %v781_v46, %v761_v45 }
 0x645   :  { %v783_v63 = vpop.f32.mrf.mxu2 }
 0x647   :  { %v758_v57 = vpop.f32.mrf.mxu0 }
 0x648   :  { %v762_v61 = vadd.f32 %v758_v57, %v736_v56 }
 0x64a   :  { %v787_v9 = vadd.f32 %v783_v63, %v762_v61 }
 0x64c   :  { %v788_v37 = vpack.c.bf16 %v787_v9, %v786_v7 }
 0x64e   :  { %2320 = vmatmul.msk.bf16.vlgmr.msrb.gmra.mxu3 %vm154_vm0, %v788_v37 }
 0x6d1   :  { %v814_v11 = vpop.f32.mrf.mxu3 }
 0x6d2   :  { %v815_v16 = vadd.f32 %v814_v11, %v789_v51 }
 0x6d9   :  { %v816_v12 = vpop.f32.mrf.mxu3 }
 0x6da   :  { %v817_v49 = vadd.f32 %v816_v12, %v789_v51 }
 0x6dc   :  { %v819_v17 = vpack.c.bf16 %v817_v49, %v815_v16 }
 0x6de   :  { %2321 = vmatmul.msk.bf16.vlgmr.msra.gmra.mxu0 %vm154_vm0, %v819_v17 }
 0x75b   :  { %v832_v19 = vpop.f32.mrf.mxu0 }
 0x75c   :  { %v840_v22 = vmul.f32 %v832_v19, %v2892_v54  ;;  %v838_v52 = vmul.f32 %v832_v19, %v2877_v53  ;;  %v842_v26 = vmul.f32 %v832_v19, %v2882_v3  ;;  %v844_v15 = vmul.f32 %v832_v19, %v2887_v4 }
 0x75e   :  { %v848_v8 = vpack.c.bf16 %v840_v22, %v840_v22  ;;  %v846_v27 = vpack.c.bf16 %v838_v52, %v838_v52  ;;  %v850_v28 = vpack.c.bf16 %v842_v26, %v842_v26  ;;  %v852_v29 = vpack.c.bf16 %v844_v15, %v844_v15 }
 0x760   :  { %v864_v33 = vunpack.c.l.b16 %v848_v8  ;;  %v862_v25 = vunpack.c.l.b16 %v846_v27  ;;  %v866_v21 = vunpack.c.l.b16 %v850_v28  ;;  %v868_v41 = vunpack.c.l.b16 %v852_v29 }
 0x763   :  { %v834_v10 = vpop.f32.mrf.mxu0 }
 0x764   :  { %v839_v30 = vmul.f32 %v834_v10, %v2900_v58  ;;  %v841_v31 = vmul.f32 %v834_v10, %v2916_v62  ;;  %v843_v24 = vmul.f32 %v834_v10, %v2905_v59  ;;  %v845_v32 = vmul.f32 %v834_v10, %v2910_v60 }
 0x765   :  { %v837_v54 = vpack.c.bf16 %v834_v10, %v832_v19 }
 0x766   :  { %v847_v53 = vpack.c.bf16 %v839_v30, %v839_v30  ;;  %v849_v35 = vpack.c.bf16 %v841_v31, %v841_v31  ;;  %v851_v3 = vpack.c.bf16 %v843_v24, %v843_v24  ;;  %v853_v14 = vpack.c.bf16 %v845_v32, %v845_v32 }
 0x767   :  { %v887_v4 = vsel %vm154_vm0, %v837_v54, 0 }
 0x768   :  { %896 = vmatpush.bf16.xpose.msrb.mxu2 %v887_v4  ;;  %v865_v20 = vunpack.c.l.b16 %v849_v35  ;;  %v863_v58 = vunpack.c.l.b16 %v847_v53  ;;  %v867_v44 = vunpack.c.l.b16 %v851_v3  ;;  %v869_v62 = vunpack.c.l.b16 %v853_v14 }
 0x76a   :  { %v871_v59 = vpack.c.b16 %v865_v20, %v864_v33  ;;  %v870_v60 = vpack.c.b16 %v863_v58, %v862_v25  ;;  %v872_v46 = vpack.c.b16 %v867_v44, %v866_v21  ;;  %v873_v47 = vpack.c.b16 %v869_v62, %v868_v41 }
 0x76c   :  { %1046 = vmatpush.bf16.msra.mxu3 %v871_v59  ;;  %1069 = vmatpush.bf16.msrb.mxu0 %v870_v60 }
 0x76f   :  { %2322 = vmatmul.msk.bf16.vlgmr.msrb.gmra.mxu2 %vm154_vm0, %v870_v60 }
 0x770   :  { %1353 = vmatpush.bf16.msra.mxu2 %v2854_v39  ;;  %1092 = vmatpush.bf16.msrb.mxu3 %v872_v46 }
 0x771   :  { %1117 = vmatpush.bf16.msra.mxu0 %v873_v47 }
 0x774   :  { %1354 = vmatpush.bf16.msra.mxu2 %v2861_v40 }
 0x77f   :  { %2323 = vmatmul.msk.bf16.gmra.mxu2 %vm154_vm0, %v871_v59 }
 0x78f   :  { %2324 = vmatmul.msk.bf16.gmra.mxu2 %vm154_vm0, %v872_v46 }
 0x79f   :  { %2325 = vmatmul.msk.bf16.gmra.mxu2 %vm154_vm0, %v873_v47 }
 0x7f2   :  { %v898_v36 = vpop.f32.mrf.mxu2 }
 0x7f3   :  { %v918_v31 = vmul.f32 0.35355338, %v898_v36 }
 0x7f5   :  { %v926_v54 = vadd.f32 %v918_v31, %v2932_v34 }
 0x7f7   :  { %v934_v4 = vsel %vm595_vm10, %v926_v54, -inf }
 0x7fa   :  { %v900_v50 = vpop.f32.mrf.mxu2 }
 0x7fb   :  { %v919_v14 = vmul.f32 0.35355338, %v900_v50 }
 0x7fd   :  { %v927_v41 = vadd.f32 %v919_v14, %v2939_v43 }
 0x7ff   :  { %v937_v34 = vsel %vm595_vm10, %v927_v41, -inf }
 0x802   :  { %v903_v56 = vpop.f32.mrf.mxu2 }
 0x803   :  { %v920_v45 = vmul.f32 0.35355338, %v903_v56 }
 0x805   :  { %v928_v57 = vadd.f32 %v920_v45, %v2946_v48 }
 0x807   :  { %v940_v61 = vsel %vm595_vm10, %v928_v57, -inf }
 0x808   :  { %941 = vmax.xlane.f32.xlu2 %v940_v61 }
 0x80a   :  { %v905_v63 = vpop.f32.mrf.mxu2 }
 0x80b   :  { %v921_v7 = vmul.f32 0.35355338, %v905_v63 }
 0x80d   :  { %v929_v9 = vadd.f32 %v921_v7, %v2953_v55 }
 0x80f   :  { %v943_v37 = vsel %vm595_vm10, %v929_v9, -inf }
 0x810   :  { %944 = vmax.xlane.f32.xlu0 %v943_v37 }
 0x812   :  { %v908_v11 = vpop.f32.mrf.mxu2 }
 0x813   :  { %v922_v51 = vmul.f32 0.35355338, %v908_v11 }
 0x815   :  { %v930_v12 = vadd.f32 %v922_v51, %v2960_v0 }
 0x817   :  { %v946_v16 = vsel %vm595_vm10, %v930_v12, -inf }
 0x818   :  { %947 = vmax.xlane.f32.xlu1 %v946_v16 }
 0x81a   :  { %v910_v49 = vpop.f32.mrf.mxu2 }
 0x81b   :  { %v923_v17 = vmul.f32 0.35355338, %v910_v49 }
 0x81d   :  { %v931_v48 = vadd.f32 %v923_v17, %v2981_v23 }
 0x81f   :  { %v949_v19 = vsel %vm595_vm10, %v931_v48, -inf }
 0x820   :  { %950 = vmax.xlane.f32.xlu2 %v949_v19 }
 0x822   :  { %v913_v28 = vpop.f32.mrf.mxu2 }
 0x823   :  { %v924_v44 = vmul.f32 0.35355338, %v913_v28 }
 0x825   :  { %v932_v60 = vadd.f32 %v924_v44, %v2967_v13 }
 0x827   :  { %v952_v46 = vsel %vm595_vm10, %v932_v60, -inf }
 0x82a   :  { %v915_v53 = vpop.f32.mrf.mxu2 }
 0x82b   :  { %v925_v21 = vmul.f32 0.35355338, %v915_v53 }
 0x82d   :  { %v933_v20 = vadd.f32 %v925_v21, %v2974_v18 }
 0x82f   :  { %v955_v59 = vsel %vm595_vm10, %v933_v20, -inf }
 0x87b   :  { %v942_v22 = vpop.xlane.xlu2 %941 }
 0x87c   :  { %v960_v52 = vsub.f32 %v928_v57, %v942_v22 }
 0x87e   :  { %v970_v55 = vmul.f32 1.442695, %v960_v52 }
 0x880   :  { %2470 = vpow2.f32 %v970_v55 }
 0x883   :  { %v945_v26 = vpop.xlane.xlu0 %944 }
 0x884   :  { %v961_v15 = vsub.f32 %v929_v9, %v945_v26 }
 0x886   :  { %v2471_v8 = vpop.eup %2470  ;;  %v972_v27 = vmul.f32 1.442695, %v961_v15 }
 0x887   :  { %v988_v0 = vsel %vm595_vm10, %v2471_v8, 0.0 }
 0x888   :  { %2472 = vpow2.f32 %v972_v27  ;;  %989 = vadd.xlane.f32.xlu0 %v988_v0 }
 0x88b   :  { %v948_v29 = vpop.xlane.xlu1 %947 }
 0x88c   :  { %v962_v10 = vsub.f32 %v930_v12, %v948_v29 }
 0x88e   :  { %v2473_v30 = vpop.eup %2472  ;;  %v974_v23 = vmul.f32 1.442695, %v962_v10 }
 0x88f   :  { %v991_v24 = vsel %vm595_vm10, %v2473_v30, 0.0 }
 0x890   :  { %2474 = vpow2.f32 %v974_v23  ;;  %992 = vadd.xlane.f32.xlu1 %v991_v24 }
 0x893   :  { %v951_v32 = vpop.xlane.xlu2 %950 }
 0x894   :  { %v963_v33 = vsub.f32 %v931_v48, %v951_v32  ;;  %v2588_v48 = vld [vmem:[%s3389_s2 + $0x18] sm:$0xff] }
 0x896   :  { %v2475_v35 = vpop.eup %2474  ;;  %v976_v3 = vmul.f32 1.442695, %v963_v33 }
 0x897   :  { %v994_v25 = vsel %vm595_vm10, %v2475_v35, 0.0 }
 0x898   :  { %2476 = vpow2.f32 %v976_v3  ;;  %935 = vmax.xlane.f32.xlu1 %v934_v4  ;;  %995 = vadd.xlane.f32.xlu2 %v994_v25  ;;  %v2591_v3 = vld [vmem:[%s3389_s2] sm:$0xff] }
 0x89e   :  { %v2477_v58 = vpop.eup %2476 }
 0x89f   :  { %v997_v62 = vsel %vm595_vm10, %v2477_v58, 0.0 }
 0x8a0   :  { %938 = vmax.xlane.f32.xlu2 %v937_v34  ;;  %998 = vadd.xlane.f32.xlu0 %v997_v62 }
 0x8a1   :  { %956 = vmax.xlane.f32.xlu1 %v955_v59 }
 0x8a8   :  { %953 = vmax.xlane.f32.xlu0 %v952_v46 }
 0x8fb   :  { %v990_v47 = vpop.xlane.xlu0 %989 }
 0x8fc   :  { %2478 = vrcp.f32 %v990_v47 }
 0x902   :  { %v2479_v18 = vpop.eup %2478 }
 0x903   :  { %v993_v43 = vpop.xlane.xlu1 %992  ;;  %v1016_v36 = vmul.f32 %v2479_v18, %v2471_v8  ;;  %v2589_v8 = vld [vmem:[%s3389_s2 + $0x10] sm:$0xff] }
 0x904   :  { %2480 = vrcp.f32 %v993_v43  ;;  %v2592_v43 = vld [vmem:[%s3390_s3 + $0x38] sm:$0xff] }
 0x905   :  { %v1024_v56 = vpack.c.bf16 %v1016_v36, %v1016_v36 }
 0x907   :  { %v1032_v37 = vunpack.c.l.b16 %v1024_v56  ;;  %v2593_v56 = vld [vmem:[%s3390_s3 + $0x30] sm:$0xff] }
 0x90a   :  { %v2481_v50 = vpop.eup %2480 }
 0x90b   :  { %v1017_v45 = vmul.f32 %v2481_v50, %v2473_v30  ;;  %v936_v57 = vpop.xlane.xlu1 %935  ;;  %v996_v61 = vpop.xlane.xlu2 %995  ;;  %v2590_v30 = vld [vmem:[%s3389_s2 + $0x8] sm:$0xff] }
 0x90c   :  { %v958_v63 = vsub.f32 %v926_v54, %v936_v57  ;;  %2482 = vrcp.f32 %v996_v61  ;;  %v2594_v61 = vld [vmem:[%s3390_s3 + $0x28] sm:$0xff] }
 0x90d   :  { %v1025_v7 = vpack.c.bf16 %v1017_v45, %v1017_v45 }
 0x90e   :  { %v966_v9 = vmul.f32 1.442695, %v958_v63 }
 0x90f   :  { %v1033_v13 = vunpack.c.l.b16 %v1025_v7 }
 0x910   :  { %2484 = vpow2.f32 %v966_v9 }
 0x911   :  { %v1034_v11 = vpack.c.b16 %v1033_v13, %v1032_v37  ;;  %v2595_v37 = vld [vmem:[%s3390_s3 + $0x20] sm:$0xff] }
 0x912   :  { %v2483_v16 = vpop.eup %2482 }
 0x913   :  { %2326 = vmatmul.msk.bf16.vlgmr.msra.gmra.mxu3 %vm595_vm10, %v1034_v11  ;;  %v999_v51 = vpop.xlane.xlu0 %998  ;;  %v939_v12 = vpop.xlane.xlu2 %938  ;;  %v1018_v55 = vmul.f32 %v2483_v16, %v2475_v35  ;;  %v2596_v11 = vld [vmem:[%s3390_s3 + $0x18] sm:$0xff]  ;;  %v2597_v16 = vld [vmem:[%s3390_s3 + $0x10] sm:$0xff] }
 0x914   :  { %2486 = vrcp.f32 %v999_v51  ;;  %v959_v49 = vsub.f32 %v927_v41, %v939_v12  ;;  %v957_v17 = vpop.xlane.xlu1 %956  ;;  %1218 = vmatpush.bf16.msra.mxu3 %v2588_v48 }
 0x915   :  { %v965_v19 = vsub.f32 %v933_v20, %v957_v17  ;;  %v1026_v0 = vpack.c.bf16 %v1018_v55, %v1018_v55  ;;  %v2601_v55 = vld [vmem:[%s3391_s4 + $0x30] sm:$0xff] }
 0x916   :  { %v2485_v22 = vpop.eup %2484  ;;  %v968_v52 = vmul.f32 1.442695, %v959_v49  ;;  %v2598_v49 = vld [vmem:[%s3390_s3 + $0x8] sm:$0xff] }
 0x917   :  { %v980_v26 = vmul.f32 1.442695, %v965_v19  ;;  %v982_v15 = vsel %vm595_vm10, %v2485_v22, 0.0  ;;  %v1078_v54 = vunpack.c.l.b16 %v1026_v0  ;;  %v2599_v19 = vld [vmem:[%s3390_s3] sm:$0xff]  ;;  %v2606_v0 = vld [vmem:[%s3391_s4 + $0x8] sm:$0xff] }
 0x918   :  { %2488 = vpow2.f32 %v968_v52  ;;  %983 = vadd.xlane.f32.xlu2 %v982_v15  ;;  %1219 = vmatpush.bf16.msra.mxu3 %v2589_v8  ;;  %v2600_v52 = vld [vmem:[%s3391_s4 + $0x38] sm:$0xff]  ;;  %v2603_v15 = vld [vmem:[%s3391_s4 + $0x20] sm:$0xff] }
 0x919   :  { %2490 = vpow2.f32 %v980_v26  ;;  %v2602_v26 = vld [vmem:[%s3391_s4 + $0x28] sm:$0xff]  ;;  %v2604_v8 = vld [vmem:[%s3391_s4 + $0x18] sm:$0xff] }
 0x91a   :  { %v2487_v27 = vpop.eup %2486 }
 0x91b   :  { %v1019_v28 = vmul.f32 %v2487_v27, %v2477_v58  ;;  %v954_v29 = vpop.xlane.xlu0 %953  ;;  %v2605_v27 = vld [vmem:[%s3391_s4 + $0x10] sm:$0xff] }
 0x91c   :  { %v964_v10 = vsub.f32 %v932_v60, %v954_v29  ;;  %1220 = vmatpush.bf16.msra.mxu3 %v2590_v30  ;;  %v2418_v60 = vld [vmem:[%s3396_s9 + $0x18] sm:$0xff]  ;;  %v2607_v29 = vld [vmem:[%s3391_s4] sm:$0xff] }
 0x91d   :  { %v1027_v23 = vpack.c.bf16 %v1019_v28, %v1019_v28  ;;  %1149 = vmatpush.bf16.msra.mxu1 %v2418_v60 }
 0x91e   :  { %v2489_v31 = vpop.eup %2488  ;;  %v978_v24 = vmul.f32 1.442695, %v964_v10 }
 0x91f   :  { %v2491_v32 = vpop.eup %2490  ;;  %v1079_v33 = vunpack.c.l.b16 %v1027_v23  ;;  %v985_v53 = vsel %vm595_vm10, %v2489_v31, 0.0 }
 0x920   :  { %2492 = vpow2.f32 %v978_v24  ;;  %986 = vadd.xlane.f32.xlu0 %v985_v53  ;;  %v1003_v35 = vsel %vm595_vm10, %v2491_v32, 0.0  ;;  %1221 = vmatpush.bf16.msra.mxu3 %v2591_v3 }
 0x921   :  { %v1080_v14 = vpack.c.b16 %v1079_v33, %v1078_v54  ;;  %1004 = vadd.xlane.f32.xlu2 %v1003_v35 }
 0x923   :  { %2328 = vmatmul.msk.bf16.vlgmr.msrb.gmra.mxu3 %vm595_vm10, %v1080_v14 }
 0x924   :  { %1331 = vmatpush.bf16.msrb.mxu3 %v2826_v1 }
 0x926   :  { %v2493_v4 = vpop.eup %2492 }
 0x927   :  { %v1000_v25 = vsel %vm595_vm10, %v2493_v4, 0.0 }
 0x928   :  { %1001 = vadd.xlane.f32.xlu1 %v1000_v25  ;;  %1332 = vmatpush.bf16.msrb.mxu3 %v2832_v2 }
 0x92c   :  { %1333 = vmatpush.bf16.msrb.mxu3 %v2838_v5 }
 0x930   :  { %1334 = vmatpush.bf16.msrb.mxu3 %v2844_v6 }
 0x933   :  { %2339 = vmatmul.msk.bf16.vlgmr.msra.gmra.mxu3 %vm197_vm1, %v2847_v38 }
 0x934   :  { %1371 = vmatpush.bf16.msra.mxu3 %v2854_v39 }
 0x938   :  { %1372 = vmatpush.bf16.msra.mxu3 %v2861_v40 }
 0x98b   :  { %v984_v21 = vpop.xlane.xlu2 %983 }
 0x98c   :  { %2494 = vrcp.f32 %v984_v21 }
 0x992   :  { %v2495_v41 = vpop.eup %2494 }
 0x993   :  { %v987_v1 = vpop.xlane.xlu0 %986  ;;  %v1014_v58 = vmul.f32 %v2495_v41, %v2485_v22  ;;  %v2417_v22 = vld [vmem:[%s3396_s9 + $0x10] sm:$0xff] }
 0x994   :  { %2496 = vrcp.f32 %v987_v1  ;;  %v1005_v34 = vpop.xlane.xlu2 %1004  ;;  %1150 = vmatpush.bf16.msra.mxu1 %v2417_v22 }
 0x995   :  { %v1022_v44 = vpack.c.bf16 %v1014_v58, %v1014_v58 }
 0x996   :  { %v3067_v20 = vpop.f32.mrf.mxu3 }
 0x997   :  { %v1055_v39 = vunpack.c.l.b16 %v1022_v44 }
 0x998   :  { %1279 = vmatpush.bf16.msrb.mxu1 %v2600_v52 }
 0x99a   :  { %v2497_v2 = vpop.eup %2496 }
 0x99b   :  { %v1015_v5 = vmul.f32 %v2497_v2, %v2489_v31  ;;  %v1002_v6 = vpop.xlane.xlu1 %1001 }
 0x99c   :  { %2498 = vrcp.f32 %v1002_v6  ;;  %1280 = vmatpush.bf16.msrb.mxu1 %v2601_v55 }
 0x99d   :  { %v1023_v62 = vpack.c.bf16 %v1015_v5, %v1015_v5  ;;  %2500 = vrcp.f32 %v1005_v34 }
 0x99e   :  { %v3069_v38 = vpop.f32.mrf.mxu3 }
 0x99f   :  { %v1056_v40 = vunpack.c.l.b16 %v1023_v62 }
 0x9a0   :  { %1281 = vmatpush.bf16.msrb.mxu1 %v2602_v26 }
 0x9a1   :  { %v1057_v59 = vpack.c.b16 %v1056_v40, %v1055_v39 }
 0x9a2   :  { %v2499_v46 = vpop.eup %2498 }
 0x9a3   :  { %2327 = vmatmul.msk.bf16.vlgmr.msrb.gmra.mxu0 %vm595_vm10, %v1057_v59  ;;  %v2501_v47 = vpop.eup %2500  ;;  %v1020_v18 = vmul.f32 %v2499_v46, %v2493_v4 }
 0x9a4   :  { %1265 = vmatpush.bf16.msrb.mxu0 %v2592_v43  ;;  %v1021_v50 = vmul.f32 %v2501_v47, %v2491_v32  ;;  %1282 = vmatpush.bf16.msrb.mxu1 %v2603_v15 }
 0x9a5   :  { %v1028_v45 = vpack.c.bf16 %v1020_v18, %v1020_v18 }
 0x9a6   :  { %v1094_v36 = vpop.f32.mrf.mxu3  ;;  %v1029_v57 = vpack.c.bf16 %v1021_v50, %v1021_v50 }
 0x9a7   :  { %v1103_v63 = vunpack.c.l.b16 %v1028_v45 }
 0x9a8   :  { %1266 = vmatpush.bf16.msrb.mxu0 %v2593_v56  ;;  %v1104_v9 = vunpack.c.l.b16 %v1029_v57  ;;  %1283 = vmatpush.bf16.msrb.mxu1 %v2604_v8 }
 0x9aa   :  { %v1105_v13 = vpack.c.b16 %v1104_v9, %v1103_v63 }
 0x9ac   :  { %1267 = vmatpush.bf16.msrb.mxu0 %v2594_v61  ;;  %1284 = vmatpush.bf16.msrb.mxu1 %v2605_v27  ;;  %v3145_v61 = vld [vmem:[%s3397_s10] sm:$0xff] }
 0x9ad   :  { %v1127_v63 = vperm.slane %v3145_v61, 3 }
 0x9ae   :  { %v1096_v7 = vpop.f32.mrf.mxu3 }
 0x9b0   :  { %1268 = vmatpush.bf16.msrb.mxu0 %v2595_v37  ;;  %1285 = vmatpush.bf16.msrb.mxu1 %v2606_v0 }
 0x9b3   :  { %2329 = vmatmul.msk.bf16.vlgmr.msra.gmra.mxu0 %vm595_vm10, %v1105_v13 }
 0x9b4   :  { %1269 = vmatpush.bf16.msrb.mxu0 %v2596_v11  ;;  %1286 = vmatpush.bf16.msrb.mxu1 %v2607_v29 }
 0x9b6   :  { %v3091_v51 = vpop.f32.mrf.mxu3 }
 0x9b7   :  { %v1228_v12 = vmul.f32 %v3091_v51, %v3091_v51 }
 0x9b8   :  { %1270 = vmatpush.bf16.msrb.mxu0 %v2597_v16 }
 0x9b9   :  { %1230 = vrot.lane.b32.xlu0 %v1228_v12, %s2655_s19 }
 0x9bc   :  { %1271 = vmatpush.bf16.msrb.mxu0 %v2598_v49 }
 0x9be   :  { %v3102_v17 = vpop.f32.mrf.mxu3 }
 0x9bf   :  { %v1229_v48 = vmul.f32 %v3102_v17, %v3102_v17 }
 0x9c0   :  { %1272 = vmatpush.bf16.msrb.mxu0 %v2599_v19 }
 0x9c1   :  { %1232 = vrot.lane.b32.xlu1 %v1229_v48, %s2655_s19 }
 0xa20   :  { %v1071_v28 = vpop.f32.mrf.mxu0 }
 0xa21   :  { %v1072_v24 = vadd.f32 %v1071_v28, %v3067_v20 }
 0xa23   :  { %v1099_v3 = vadd.f32 %v1094_v36, %v1072_v24 }
 0xa28   :  { %v1073_v10 = vpop.f32.mrf.mxu0 }
 0xa29   :  { %v1074_v32 = vadd.f32 %v1073_v10, %v3069_v38 }
 0xa2b   :  { %v1231_v30 = vpop.permute.xlu0 %1230  ;;  %v1100_v14 = vadd.f32 %v1096_v7, %v1074_v32 }
 0xa2c   :  { %v1234_v23 = vadd.f32 %v1231_v30, %v1228_v12 }
 0xa2e   :  { %2502 = vrsqrt.f32 %v1234_v23  ;;  %vm1243_vm11 = vcmp.eq.f32.partialorder %v1234_v23, inf  ;;  %v1246_v40 = vand.u32 2147483648, %v1234_v23  ;;  %vm1245_vm12 = vcmp.eq.f32.partialorder %v1234_v23, 0.0 }
 0xa30   :  { %v1119_v31 = vpop.f32.mrf.mxu0 }
 0xa31   :  { %v1124_v21 = vadd.f32 %v1119_v31, %v1099_v3 }
 0xa33   :  { %v1233_v54 = vpop.permute.xlu1 %1232 }
 0xa34   :  { %v2503_v33 = vpop.eup %2502  ;;  %v1235_v53 = vadd.f32 %v1233_v54, %v1229_v48 }
 0xa35   :  { %v1237_v35 = vmul.f32 %v2503_v33, %v1234_v23 }
 0xa36   :  { %2504 = vrsqrt.f32 %v1235_v53  ;;  %vm1255_vm13 = vcmp.eq.f32.partialorder %v1235_v53, inf  ;;  %v1258_v47 = vand.u32 2147483648, %v1235_v53  ;;  %vm1257_vm14 = vcmp.eq.f32.partialorder %v1235_v53, 0.0 }
 0xa37   :  { %v1238_v4 = vmul.f32 %v2503_v33, %v1237_v35 }
 0xa38   :  { %v1121_v25 = vpop.f32.mrf.mxu0 }
 0xa39   :  { %v1125_v1 = vadd.f32 %v1121_v25, %v1100_v14  ;;  %v1239_v41 = vmul.f32 0.5, %v1238_v4 }
 0xa3b   :  { %v1126_v58 = vpack.c.bf16 %v1125_v1, %v1124_v21  ;;  %v1240_v2 = vsub.f32 1.5, %v1239_v41  ;;  %v2656_v1 = vmov 32.0  }
 0xa3c   :  { %v2505_v44 = vpop.eup %2504 }
 0xa3d   :  { %v1249_v5 = vmul.f32 %v2505_v44, %v1235_v53  ;;  %2338 = vmatmul.msk.bf16.vlgmr.msra.gmra.mxu1 %vm154_vm0, %v1126_v58  ;;  %v1241_v20 = vmul.f32 %v2503_v33, %v1240_v2 }
 0xa3f   :  { %v1242_v34 = vmul.f32 %v1241_v20, %v1234_v23  ;;  %v1250_v6 = vmul.f32 %v2505_v44, %v1249_v5 }
 0xa41   :  { %v1251_v62 = vmul.f32 0.5, %v1250_v6  ;;  %v1244_v38 = vsel %vm1243_vm11, %v1234_v23, %v1242_v34 }
 0xa42   :  { %v1247_v60 = vsel %vm1245_vm12, %v1246_v40, %v1244_v38 }
 0xa43   :  { %v1252_v39 = vsub.f32 1.5, %v1251_v62  ;;  %v1260_v18 = vadd.f32 1.0, %v1247_v60 }
 0xa45   :  { %v1253_v59 = vmul.f32 %v2505_v44, %v1252_v39  ;;  %v1262_v56 = vmul.f32 %v1260_v18, %v3091_v51 }
 0xa47   :  { %v1254_v46 = vmul.f32 %v1253_v59, %v1235_v53 }
 0xa49   :  { %v1256_v43 = vsel %vm1255_vm13, %v1235_v53, %v1254_v46 }
 0xa4a   :  { %v1259_v36 = vsel %vm1257_vm14, %v1258_v47, %v1256_v43 }
 0xa4b   :  { %v1261_v50 = vadd.f32 1.0, %v1259_v36 }
 0xa4d   :  { %v1263_v45 = vmul.f32 %v1261_v50, %v3102_v17 }
 0xa4f   :  { %v1264_v57 = vpack.c.bf16 %v1263_v45, %v1262_v56 }
 0xa51   :  { %1273 = vmatmul.bf16.vlgmr.msrb.gmra.mxu0 %v1264_v57  ;;  %1287 = vmatmul.bf16.vlgmr.msrb.gmra.mxu1 %v1264_v57 }
 0xaba   :  { %v1152_v7 = vpop.f32.mrf.mxu1 }
 0xabb   :  { %v1153_v9 = vadd.f32 %v1152_v7, %v1127_v63 }
 0xabd   :  { %v1157_v37 = vsel %vm154_vm0, %v1153_v9, 0.0 }
 0xabe   :  { %1158 = vadd.xlane.f32.xlu2 %v1157_v37 }
 0xac2   :  { %v1154_v13 = vpop.f32.mrf.mxu1 }
 0xac3   :  { %v1155_v11 = vadd.f32 %v1154_v13, %v1127_v63 }
 0xac5   :  { %v1160_v51 = vsel %vm154_vm0, %v1155_v11, 0.0 }
 0xac6   :  { %1161 = vadd.xlane.f32.xlu2 %v1160_v51 }
 0xace   :  { %v1274_v12 = vpop.f32.mrf.mxu0  ;;  %v1288_v16 = vpop.f32.mrf.mxu1 }
 0xacf   :  { %v1293_v49 = vmul.f32 %v1274_v12, %v1274_v12  ;;  %v1295_v17 = vmul.f32 %v1288_v16, %v1288_v16 }
 0xad1   :  { %v1297_v48 = vadd.f32 %v1295_v17, %v1293_v49 }
 0xad3   :  { %2506 = vrsqrt.f32 %v1297_v48  ;;  %vm1306_vm15 = vcmp.eq.f32.partialorder %v1297_v48, inf  ;;  %v1309_v35 = vand.u32 2147483648, %v1297_v48  ;;  %vm1308_vm3 = vcmp.eq.f32.partialorder %v1297_v48, 0.0 }
 0xad6   :  { %v1276_v19 = vpop.f32.mrf.mxu0  ;;  %v1290_v22 = vpop.f32.mrf.mxu1 }
 0xad7   :  { %v1294_v52 = vmul.f32 %v1276_v19, %v1276_v19  ;;  %v1296_v55 = vmul.f32 %v1290_v22, %v1290_v22  ;;  %v3163_v22 = vld [vmem:[%s3397_s10 + $0x8] sm:$0xff] }
 0xad9   :  { %v2507_v26 = vpop.eup %2506  ;;  %v1298_v15 = vadd.f32 %v1296_v55, %v1294_v52 }
 0xada   :  { %v1300_v8 = vmul.f32 %v2507_v26, %v1297_v48 }
 0xadb   :  { %2508 = vrsqrt.f32 %v1298_v15  ;;  %vm1318_vm2 = vcmp.eq.f32.partialorder %v1298_v15, inf  ;;  %v1321_v3 = vand.u32 2147483648, %v1298_v15  ;;  %vm1320_vm4 = vcmp.eq.f32.partialorder %v1298_v15, 0.0 }
 0xadc   :  { %v1301_v27 = vmul.f32 %v2507_v26, %v1300_v8  ;;  %2510 = vrcp.f32 %v2656_v1  ;;  %v3191_v1 = vld [vmem:[%s3394_s7 + $0x30] sm:$0xff] }
 0xade   :  { %v1302_v0 = vmul.f32 0.5, %v1301_v27 }
 0xae0   :  { %v1303_v28 = vsub.f32 1.5, %v1302_v0 }
 0xae1   :  { %v2509_v29 = vpop.eup %2508 }
 0xae2   :  { %v1312_v10 = vmul.f32 %v2509_v29, %v1298_v15  ;;  %v1304_v30 = vmul.f32 %v2507_v26, %v1303_v28  ;;  %v2511_v41 = vpop.eup %2510  ;;  %v1211_v26 = vperm.slane %v3163_v22, 0 }
 0xae3   :  { %v1164_v58 = vmul.f32 32.0, %v2511_v41  ;;  %vm1168_vm5 = vweird.f32 %v2511_v41 }
 0xae4   :  { %v1313_v23 = vmul.f32 %v2509_v29, %v1312_v10  ;;  %v1305_v24 = vmul.f32 %v1304_v30, %v1297_v48 }
 0xae5   :  { %v1165_v2 = vsub.f32 1.0, %v1164_v58 }
 0xae6   :  { %v1314_v31 = vmul.f32 0.5, %v1313_v23  ;;  %v1307_v33 = vsel %vm1306_vm15, %v1297_v48, %v1305_v24  ;;  %v1208_v48 = vperm.slane %v3145_v61, 6 }
 0xae7   :  { %v1310_v4 = vsel %vm1308_vm3, %v1309_v35, %v1307_v33  ;;  %v1166_v44 = vmul.f32 %v2511_v41, %v1165_v2 }
 0xae8   :  { %v1315_v32 = vsub.f32 1.5, %v1314_v31 }
 0xae9   :  { %v1167_v5 = vadd.f32 %v2511_v41, %v1166_v44 }
 0xaea   :  { %v1316_v54 = vmul.f32 %v2509_v29, %v1315_v32 }
 0xaeb   :  { %v3151_v20 = vsel %vm1168_vm5, %v2511_v41, %v1167_v5 }
 0xaec   :  { %v1317_v53 = vmul.f32 %v1316_v54, %v1298_v15 }
 0xaee   :  { %v1319_v14 = vsel %vm1318_vm2, %v1298_v15, %v1317_v53 }
 0xaef   :  { %v1322_v25 = vsel %vm1320_vm4, %v1321_v3, %v1319_v14  ;;  %v3173_v3 = vld [vmem:[%s3394_s7 + $0x10] sm:$0xff] }
 0xaf0   :  { %v1323_v21 = vpack.c.bf16 %v1322_v25, %v1310_v4  ;;  %v3185_v25 = vld [vmem:[%s3394_s7 + $0x20] sm:$0xff] }
 0xaf2   :  { %2340 = vmatmul.msk.bf16.vlgmr.msrb.gmra.mxu3 %vm197_vm1, %v1323_v21 }
 0xb31   :  { %v1159_v34 = vpop.xlane.xlu2 %1158 }
 0xb32   :  { %v1170_v6 = vmul.f32 %v3151_v20, %v1159_v34 }
 0xb34   :  { %v1172_v62 = vsub.f32 %v1153_v9, %v1170_v6  ;;  %v3197_v6 = vld [vmem:[%s3394_s7 + $0x8] sm:$0xff] }
 0xb36   :  { %v1174_v38 = vmul.f32 %v1172_v62, %v1172_v62 }
 0xb38   :  { %v1176_v39 = vsel %vm154_vm0, %v1174_v38, 0.0  ;;  %v3203_v38 = vld [vmem:[%s3394_s7 + $0x18] sm:$0xff] }
 0xb39   :  { %1177 = vadd.xlane.f32.xlu0 %v1176_v39  ;;  %v1162_v40 = vpop.xlane.xlu2 %1161 }
 0xb3a   :  { %v1171_v59 = vmul.f32 %v3151_v20, %v1162_v40  ;;  %v3209_v40 = vld [vmem:[%s3394_s7 + $0x28] sm:$0xff] }
 0xb3c   :  { %v1173_v60 = vsub.f32 %v1155_v11, %v1171_v59 }
 0xb3e   :  { %v1175_v46 = vmul.f32 %v1173_v60, %v1173_v60 }
 0xb40   :  { %v1179_v47 = vsel %vm154_vm0, %v1175_v46, 0.0 }
 0xb41   :  { %1180 = vadd.xlane.f32.xlu2 %v1179_v47 }
 0xb75   :  { %v1336_v12 = vpop.f32.mrf.mxu3 }
 0xb76   :  { %v1337_v10 = vadd.f32 %v1336_v12, %v2866_v42 }
 0xb7d   :  { %v1338_v0 = vpop.f32.mrf.mxu3 }
 0xb7e   :  { %v1339_v30 = vadd.f32 %v1338_v0, %v2866_v42  ;;  %v3179_v42 = vld [vmem:[%s3394_s7] sm:$0xff] }
 0xbac   :  { %v1178_v43 = vpop.xlane.xlu0 %1177 }
 0xbad   :  { %v1182_v18 = vmul.f32 %v1178_v43, %v3151_v20 }
 0xbaf   :  { %v1184_v36 = vadd.f32 1e-05, %v1182_v18 }
 0xbb1   :  { %2512 = vrsqrt.f32 %v1184_v36  ;;  %vm1192_vm6 = vweird.f32 %v1184_v36 }
 0xbb4   :  { %v1181_v50 = vpop.xlane.xlu2 %1180 }
 0xbb5   :  { %v1183_v56 = vmul.f32 %v1181_v50, %v3151_v20 }
 0xbb7   :  { %v2513_v45 = vpop.eup %2512  ;;  %v1185_v57 = vadd.f32 1e-05, %v1183_v56 }
 0xbb8   :  { %v1187_v63 = vmul.f32 %v2513_v45, %v1184_v36  ;;  %vm1193_vm1 = vweird.f32 %v2513_v45 }
 0xbb9   :  { %2514 = vrsqrt.f32 %v1185_v57  ;;  %vm1194_vm7 = vmor %vm1192_vm6, %vm1193_vm1  ;;  %vm1202_vm9 = vweird.f32 %v1185_v57 }
 0xbba   :  { %v1188_v7 = vmul.f32 %v2513_v45, %v1187_v63 }
 0xbbc   :  { %v1189_v9 = vmul.f32 0.5, %v1188_v7 }
 0xbbe   :  { %v1190_v37 = vsub.f32 1.5, %v1189_v9 }
 0xbbf   :  { %v2515_v13 = vpop.eup %2514 }
 0xbc0   :  { %v1191_v11 = vmul.f32 %v2513_v45, %v1190_v37  ;;  %v1197_v51 = vmul.f32 %v2515_v13, %v1185_v57  ;;  %vm1203_vm8 = vweird.f32 %v2515_v13 }
 0xbc1   :  { %vm1204_vm11 = vmor %vm1202_vm9, %vm1203_vm8 }
 0xbc2   :  { %v1195_v16 = vsel %vm1194_vm7, %v2513_v45, %v1191_v11  ;;  %v1198_v49 = vmul.f32 %v2515_v13, %v1197_v51 }
 0xbc3   :  { %v1206_v19 = vmul.f32 %v1195_v16, %v1172_v62 }
 0xbc4   :  { %v1199_v17 = vmul.f32 0.5, %v1198_v49 }
 0xbc5   :  { %v1209_v15 = vmul.f32 %v1208_v48, %v1206_v19 }
 0xbc6   :  { %v1200_v52 = vsub.f32 1.5, %v1199_v17  ;;  %v2617_v17 = vld [vmem:[%s3393_s6 + $0x8] sm:$0xff] }
 0xbc7   :  { %v1212_v28 = vadd.f32 %v1211_v26, %v1209_v15  ;;  %v3232_v15 = vld [vmem:[%s3395_s8 + $0x10] sm:$0xff] }
 0xbc8   :  { %v1201_v55 = vmul.f32 %v2515_v13, %v1200_v52 }
 0xbc9   :  { %v1341_v31 = vadd.f32 %v1337_v10, %v1212_v28  ;;  %v3239_v10 = vld [vmem:[%s3395_s8] sm:$0xff] }
 0xbca   :  { %v1205_v8 = vsel %vm1204_vm11, %v2515_v13, %v1201_v55 }
 0xbcb   :  { %v1207_v27 = vmul.f32 %v1205_v8, %v1173_v60  ;;  %v3215_v60 = vld [vmem:[%s3394_s7 + $0x38] sm:$0xff] }
 0xbcd   :  { %v1210_v29 = vmul.f32 %v1208_v48, %v1207_v27  ;;  %v2618_v48 = vld [vmem:[%s3393_s6] sm:$0xff] }
 0xbcf   :  { %v1213_v23 = vadd.f32 %v1211_v26, %v1210_v29 }
 0xbd1   :  { %v1342_v24 = vadd.f32 %v1339_v30, %v1213_v23  ;;  %v3245_v23 = vld [vmem:[%s3395_s8 + $0x18] sm:$0xff] }
 0xbd3   :  { %v1343_v32 = vpack.c.bf16 %v1342_v24, %v1341_v31 }
 0xbd5   :  { %2341 = vmatmul.msk.bf16.vlgmr.msra.gmra.mxu2 %vm154_vm0, %v1343_v32 }
 0xc58   :  { %v1356_v54 = vpop.f32.mrf.mxu2 }
 0xc60   :  { %v1358_v33 = vpop.f32.mrf.mxu2 }
 0xc61   :  { %v1361_v53 = vpack.c.bf16 %v1358_v33, %v1356_v54 }
 0xc63   :  { %2342 = vmatmul.msk.bf16.vlgmr.msra.gmra.mxu3 %vm154_vm0, %v1361_v53  ;;  %v3253_v53 = vld [vmem:[%s3395_s8 + $0x8] sm:$0xff] }
 0xce6   :  { %v1374_v35 = vpop.f32.mrf.mxu3 }
 0xce7   :  { %v1382_v14 = vmul.f32 %v3173_v3, %v1374_v35  ;;  %v1380_v4 = vmul.f32 %v3179_v42, %v1374_v35  ;;  %v1384_v21 = vmul.f32 %v3185_v25, %v1374_v35  ;;  %v1386_v41 = vmul.f32 %v3191_v1, %v1374_v35 }
 0xce9   :  { %v1390_v58 = vpack.c.bf16 %v1382_v14, %v1382_v14  ;;  %v1388_v2 = vpack.c.bf16 %v1380_v4, %v1380_v4  ;;  %v1392_v44 = vpack.c.bf16 %v1384_v21, %v1384_v21  ;;  %v1394_v5 = vpack.c.bf16 %v1386_v41, %v1386_v41 }
 0xceb   :  { %v1406_v43 = vunpack.c.l.b16 %v1390_v58  ;;  %v1404_v57 = vunpack.c.l.b16 %v1388_v2  ;;  %v1408_v63 = vunpack.c.l.b16 %v1392_v44  ;;  %v1410_v7 = vunpack.c.l.b16 %v1394_v5  ;;  %v3260_v58 = vld [vmem:[%s3395_s8 + $0x20] sm:$0xff]  ;;  %v3266_v44 = vld [vmem:[%s3395_s8 + $0x28] sm:$0xff] }
 0xcee   :  { %v1376_v34 = vpop.f32.mrf.mxu3 }
 0xcef   :  { %v1381_v62 = vmul.f32 %v3197_v6, %v1376_v34  ;;  %v1383_v39 = vmul.f32 %v3203_v38, %v1376_v34  ;;  %v1385_v59 = vmul.f32 %v3209_v40, %v1376_v34  ;;  %v1387_v46 = vmul.f32 %v3215_v60, %v1376_v34 }
 0xcf0   :  { %v1379_v47 = vpack.c.bf16 %v1376_v34, %v1374_v35 }
 0xcf1   :  { %v1389_v18 = vpack.c.bf16 %v1381_v62, %v1381_v62  ;;  %v1391_v36 = vpack.c.bf16 %v1383_v39, %v1383_v39  ;;  %v1393_v50 = vpack.c.bf16 %v1385_v59, %v1385_v59  ;;  %v1395_v56 = vpack.c.bf16 %v1387_v46, %v1387_v46  ;;  %v3274_v46 = vld [vmem:[%s3395_s8 + $0x30] sm:$0xff] }
 0xcf2   :  { %v1429_v45 = vsel %vm154_vm0, %v1379_v47, 0 }
 0xcf3   :  { %1438 = vmatpush.bf16.xpose.msra.mxu0 %v1429_v45  ;;  %v1407_v9 = vunpack.c.l.b16 %v1391_v36  ;;  %v1405_v37 = vunpack.c.l.b16 %v1389_v18  ;;  %v1409_v13 = vunpack.c.l.b16 %v1393_v50  ;;  %v1411_v11 = vunpack.c.l.b16 %v1395_v56  ;;  %v3281_v50 = vld [vmem:[%s3395_s8 + $0x38] sm:$0xff] }
 0xcf5   :  { %v1413_v51 = vpack.c.b16 %v1407_v9, %v1406_v43  ;;  %v1412_v12 = vpack.c.b16 %v1405_v37, %v1404_v57  ;;  %v1414_v16 = vpack.c.b16 %v1409_v13, %v1408_v63  ;;  %v1415_v49 = vpack.c.b16 %v1411_v11, %v1410_v7 }
 0xcf7   :  { %1588 = vmatpush.bf16.msra.mxu1 %v1413_v51  ;;  %1611 = vmatpush.bf16.msrb.mxu2 %v1412_v12 }
 0xcf8   :  { %1634 = vmatpush.bf16.msrb.mxu3 %v1414_v16 }
 0xcfa   :  { %2343 = vmatmul.msk.bf16.vlgmr.msra.gmra.mxu0 %vm154_vm0, %v1412_v12 }
 0xcfb   :  { %1659 = vmatpush.bf16.msrb.mxu1 %v1415_v49 }
 0xcfc   :  { %1709 = vmatpush.bf16.msra.mxu3 %v2617_v17 }
 0xd00   :  { %1710 = vmatpush.bf16.msra.mxu3 %v2618_v48 }
 0xd0a   :  { %2344 = vmatmul.msk.bf16.gmra.mxu0 %vm154_vm0, %v1413_v51 }
 0xd1a   :  { %2345 = vmatmul.msk.bf16.gmra.mxu0 %vm154_vm0, %v1414_v16 }
 0xd2a   :  { %2346 = vmatmul.msk.bf16.gmra.mxu0 %vm154_vm0, %v1415_v49 }
 0xd77   :  { %v1440_v19 = vpop.f32.mrf.mxu0 }
 0xd78   :  { %v1460_v27 = vmul.f32 0.35355338, %v1440_v19 }
 0xd7a   :  { %v1468_v30 = vadd.f32 %v3239_v10, %v1460_v27 }
 0xd7c   :  { %v1476_v32 = vsel %vm595_vm10, %v1468_v30, -inf }
 0xd7f   :  { %v1442_v52 = vpop.f32.mrf.mxu0 }
 0xd80   :  { %v1461_v24 = vmul.f32 0.35355338, %v1442_v52 }
 0xd82   :  { %v1469_v35 = vadd.f32 %v3253_v53, %v1461_v24 }
 0xd84   :  { %v1479_v4 = vsel %vm595_vm10, %v1469_v35, -inf }
 0xd87   :  { %v1445_v55 = vpop.f32.mrf.mxu0 }
 0xd88   :  { %v1462_v26 = vmul.f32 0.35355338, %v1445_v55 }
 0xd8a   :  { %v1470_v8 = vadd.f32 %v3232_v15, %v1462_v26 }
 0xd8c   :  { %v1482_v0 = vsel %vm595_vm10, %v1470_v8, -inf }
 0xd8d   :  { %1483 = vmax.xlane.f32.xlu2 %v1482_v0 }
 0xd8f   :  { %v1447_v28 = vpop.f32.mrf.mxu0 }
 0xd90   :  { %v1463_v29 = vmul.f32 0.35355338, %v1447_v28 }
 0xd92   :  { %v1471_v31 = vadd.f32 %v3245_v23, %v1463_v29 }
 0xd94   :  { %v1485_v54 = vsel %vm595_vm10, %v1471_v31, -inf }
 0xd95   :  { %1477 = vmax.xlane.f32.xlu2 %v1476_v32  ;;  %1486 = vmax.xlane.f32.xlu1 %v1485_v54 }
 0xd97   :  { %v1450_v33 = vpop.f32.mrf.mxu0 }
 0xd98   :  { %v1464_v14 = vmul.f32 0.35355338, %v1450_v33 }
 0xd9a   :  { %v1472_v2 = vadd.f32 %v3260_v58, %v1464_v14 }
 0xd9c   :  { %v1488_v34 = vsel %vm595_vm10, %v1472_v2, -inf }
 0xd9d   :  { %1480 = vmax.xlane.f32.xlu2 %v1479_v4 }
 0xd9f   :  { %v1452_v21 = vpop.f32.mrf.mxu0 }
 0xda0   :  { %v1465_v41 = vmul.f32 0.35355338, %v1452_v21 }
 0xda2   :  { %v1473_v5 = vadd.f32 %v3266_v44, %v1465_v41 }
 0xda4   :  { %v1491_v62 = vsel %vm595_vm10, %v1473_v5, -inf }
 0xda5   :  { %1489 = vmax.xlane.f32.xlu2 %v1488_v34  ;;  %1492 = vmax.xlane.f32.xlu0 %v1491_v62 }
 0xda7   :  { %v1455_v39 = vpop.f32.mrf.mxu0 }
 0xda8   :  { %v1466_v59 = vmul.f32 0.35355338, %v1455_v39 }
 0xdaa   :  { %v1474_v47 = vadd.f32 %v3274_v46, %v1466_v59 }
 0xdac   :  { %v1494_v43 = vsel %vm595_vm10, %v1474_v47, -inf }
 0xdad   :  { %1495 = vmax.xlane.f32.xlu2 %v1494_v43 }
 0xdaf   :  { %v1457_v18 = vpop.f32.mrf.mxu0 }
 0xdb0   :  { %v1467_v36 = vmul.f32 0.35355338, %v1457_v18 }
 0xdb2   :  { %v1475_v56 = vadd.f32 %v3281_v50, %v1467_v36 }
 0xdb4   :  { %v1497_v45 = vsel %vm595_vm10, %v1475_v56, -inf }
 0xdb5   :  { %1498 = vmax.xlane.f32.xlu0 %v1497_v45 }
 0xe00   :  { %v1484_v57 = vpop.xlane.xlu2 %1483 }
 0xe01   :  { %v1502_v63 = vsub.f32 %v1470_v8, %v1484_v57 }
 0xe03   :  { %v1512_v7 = vmul.f32 1.442695, %v1502_v63 }
 0xe05   :  { %2516 = vpow2.f32 %v1512_v7 }
 0xe08   :  { %v1478_v9 = vpop.xlane.xlu2 %1477  ;;  %v1487_v37 = vpop.xlane.xlu1 %1486 }
 0xe09   :  { %v1500_v13 = vsub.f32 %v1468_v30, %v1478_v9  ;;  %v1503_v11 = vsub.f32 %v1471_v31, %v1487_v37 }
 0xe0b   :  { %v2517_v51 = vpop.eup %2516  ;;  %v1508_v12 = vmul.f32 1.442695, %v1500_v13  ;;  %v1514_v16 = vmul.f32 1.442695, %v1503_v11 }
 0xe0c   :  { %v1530_v49 = vsel %vm595_vm10, %v2517_v51, 0.0 }
 0xe0d   :  { %2518 = vpow2.f32 %v1508_v12  ;;  %1531 = vadd.xlane.f32.xlu2 %v1530_v49 }
 0xe0e   :  { %2520 = vpow2.f32 %v1514_v16 }
 0xe10   :  { %v1481_v17 = vpop.xlane.xlu2 %1480 }
 0xe11   :  { %v1501_v48 = vsub.f32 %v1469_v35, %v1481_v17 }
 0xe13   :  { %v2519_v19 = vpop.eup %2518  ;;  %v1510_v52 = vmul.f32 1.442695, %v1501_v48 }
 0xe14   :  { %v2521_v55 = vpop.eup %2520  ;;  %v1524_v26 = vsel %vm595_vm10, %v2519_v19, 0.0 }
 0xe15   :  { %2522 = vpow2.f32 %v1510_v52  ;;  %v1533_v8 = vsel %vm595_vm10, %v2521_v55, 0.0  ;;  %1525 = vadd.xlane.f32.xlu0 %v1524_v26 }
 0xe16   :  { %1534 = vadd.xlane.f32.xlu1 %v1533_v8 }
 0xe18   :  { %v1490_v27 = vpop.xlane.xlu2 %1489  ;;  %v1493_v0 = vpop.xlane.xlu0 %1492 }
 0xe19   :  { %v1504_v28 = vsub.f32 %v1472_v2, %v1490_v27  ;;  %v1505_v29 = vsub.f32 %v1473_v5, %v1493_v0 }
 0xe1b   :  { %v2523_v30 = vpop.eup %2522  ;;  %v1516_v31 = vmul.f32 1.442695, %v1504_v28  ;;  %v1518_v24 = vmul.f32 1.442695, %v1505_v29 }
 0xe1c   :  { %v1527_v32 = vsel %vm595_vm10, %v2523_v30, 0.0 }
 0xe1d   :  { %2524 = vpow2.f32 %v1516_v31  ;;  %1528 = vadd.xlane.f32.xlu2 %v1527_v32 }
 0xe1e   :  { %2526 = vpow2.f32 %v1518_v24 }
 0xe20   :  { %v1496_v54 = vpop.xlane.xlu2 %1495 }
 0xe21   :  { %v1506_v33 = vsub.f32 %v1474_v47, %v1496_v54 }
 0xe23   :  { %v2525_v35 = vpop.eup %2524  ;;  %v1520_v14 = vmul.f32 1.442695, %v1506_v33 }
 0xe24   :  { %v2527_v4 = vpop.eup %2526  ;;  %v1536_v21 = vsel %vm595_vm10, %v2525_v35, 0.0 }
 0xe25   :  { %2528 = vpow2.f32 %v1520_v14  ;;  %1537 = vadd.xlane.f32.xlu1 %v1536_v21  ;;  %v1539_v41 = vsel %vm595_vm10, %v2527_v4, 0.0 }
 0xe26   :  { %1540 = vadd.xlane.f32.xlu0 %v1539_v41 }
 0xe28   :  { %v1499_v2 = vpop.xlane.xlu0 %1498 }
 0xe29   :  { %v1507_v5 = vsub.f32 %v1475_v56, %v1499_v2 }
 0xe2b   :  { %v2529_v34 = vpop.eup %2528  ;;  %v1522_v62 = vmul.f32 1.442695, %v1507_v5 }
 0xe2c   :  { %v1542_v39 = vsel %vm595_vm10, %v2529_v34, 0.0 }
 0xe2d   :  { %2530 = vpow2.f32 %v1522_v62  ;;  %1543 = vadd.xlane.f32.xlu2 %v1542_v39 }
 0xe33   :  { %v2531_v59 = vpop.eup %2530 }
 0xe34   :  { %v1545_v47 = vsel %vm595_vm10, %v2531_v59, 0.0 }
 0xe35   :  { %1546 = vadd.xlane.f32.xlu1 %v1545_v47 }
 0xe80   :  { %v1532_v43 = vpop.xlane.xlu2 %1531 }
 0xe81   :  { %2532 = vrcp.f32 %v1532_v43 }
 0xe87   :  { %v2533_v45 = vpop.eup %2532 }
 0xe88   :  { %v1526_v18 = vpop.xlane.xlu0 %1525  ;;  %v1558_v57 = vmul.f32 %v2533_v45, %v2517_v51 }
 0xe89   :  { %v1535_v36 = vpop.xlane.xlu1 %1534 }
 0xe8a   :  { %2534 = vrcp.f32 %v1535_v36  ;;  %v1566_v9 = vpack.c.bf16 %v1558_v57, %v1558_v57  ;;  %v2419_v36 = vld [vmem:[%s3396_s9 + $0x20] sm:$0xff] }
 0xe8b   :  { %2536 = vrcp.f32 %v1526_v18 }
 0xe8c   :  { %v1574_v12 = vunpack.c.l.b16 %v1566_v9 }
 0xe90   :  { %v2535_v63 = vpop.eup %2534  ;;  %v1529_v56 = vpop.xlane.xlu2 %1528 }
 0xe91   :  { %v2537_v7 = vpop.eup %2536  ;;  %v1559_v37 = vmul.f32 %v2535_v63, %v2521_v55  ;;  %2538 = vrcp.f32 %v1529_v56 }
 0xe92   :  { %v1556_v11 = vmul.f32 %v2537_v7, %v2519_v19 }
 0xe93   :  { %v1567_v13 = vpack.c.bf16 %v1559_v37, %v1559_v37 }
 0xe94   :  { %v1564_v48 = vpack.c.bf16 %v1556_v11, %v1556_v11 }
 0xe95   :  { %v1575_v16 = vunpack.c.l.b16 %v1567_v13 }
 0xe96   :  { %v1597_v27 = vunpack.c.l.b16 %v1564_v48 }
 0xe97   :  { %v2539_v49 = vpop.eup %2538  ;;  %v1576_v17 = vpack.c.b16 %v1575_v16, %v1574_v12 }
 0xe98   :  { %v1557_v52 = vmul.f32 %v2539_v49, %v2523_v30  ;;  %v1538_v26 = vpop.xlane.xlu1 %1537 }
 0xe99   :  { %2540 = vrcp.f32 %v1538_v26  ;;  %2347 = vmatmul.msk.bf16.vlgmr.msra.gmra.mxu1 %vm595_vm10, %v1576_v17  ;;  %v1541_v8 = vpop.xlane.xlu0 %1540 }
 0xe9a   :  { %v1565_v51 = vpack.c.bf16 %v1557_v52, %v1557_v52  ;;  %2542 = vrcp.f32 %v1541_v8  ;;  %v1669_v52 = vperm.slane %v3145_v61, 4 }
 0xe9c   :  { %v1598_v0 = vunpack.c.l.b16 %v1565_v51 }
 0xe9e   :  { %v1599_v28 = vpack.c.b16 %v1598_v0, %v1597_v27 }
 0xe9f   :  { %v2541_v55 = vpop.eup %2540 }
 0xea0   :  { %v2543_v29 = vpop.eup %2542  ;;  %v1560_v31 = vmul.f32 %v2541_v55, %v2525_v35  ;;  %v1544_v19 = vpop.xlane.xlu2 %1543  ;;  %2348 = vmatmul.msk.bf16.vlgmr.msrb.gmra.mxu2 %vm595_vm10, %v1599_v28 }
 0xea1   :  { %v1561_v24 = vmul.f32 %v2543_v29, %v2527_v4  ;;  %2544 = vrcp.f32 %v1544_v19  ;;  %v2420_v4 = vld [vmem:[%s3396_s9 + $0x28] sm:$0xff] }
 0xea2   :  { %v1568_v32 = vpack.c.bf16 %v1560_v31, %v1560_v31  ;;  %1691 = vmatpush.bf16.msra.mxu2 %v2420_v4 }
 0xea3   :  { %v1569_v54 = vpack.c.bf16 %v1561_v24, %v1561_v24 }
 0xea4   :  { %v1620_v30 = vunpack.c.l.b16 %v1568_v32 }
 0xea5   :  { %v1621_v33 = vunpack.c.l.b16 %v1569_v54 }
 0xea6   :  { %1692 = vmatpush.bf16.msra.mxu2 %v2419_v36 }
 0xea7   :  { %v1622_v14 = vpack.c.b16 %v1621_v33, %v1620_v30  ;;  %v2545_v41 = vpop.eup %2544 }
 0xea8   :  { %v1547_v21 = vpop.xlane.xlu1 %1546  ;;  %v1562_v2 = vmul.f32 %v2545_v41, %v2529_v34 }
 0xea9   :  { %2546 = vrcp.f32 %v1547_v21  ;;  %2349 = vmatmul.msk.bf16.vlgmr.msrb.gmra.mxu3 %vm595_vm10, %v1622_v14 }
 0xeaa   :  { %v1570_v62 = vpack.c.bf16 %v1562_v2, %v1562_v2 }
 0xeac   :  { %v1645_v47 = vunpack.c.l.b16 %v1570_v62 }
 0xeaf   :  { %v2547_v5 = vpop.eup %2546 }
 0xeb0   :  { %v1563_v39 = vmul.f32 %v2547_v5, %v2531_v59 }
 0xeb2   :  { %v1571_v35 = vpack.c.bf16 %v1563_v39, %v1563_v39 }
 0xeb4   :  { %v1646_v43 = vunpack.c.l.b16 %v1571_v35 }
 0xeb6   :  { %v1647_v18 = vpack.c.b16 %v1646_v43, %v1645_v47 }
 0xeb8   :  { %2350 = vmatmul.msk.bf16.vlgmr.msrb.gmra.mxu1 %vm595_vm10, %v1647_v18 }
 0xf16   :  { %v1590_v34 = vpop.f32.mrf.mxu1 }
 0xf1e   :  { %v1592_v45 = vpop.f32.mrf.mxu1 }
 0xf23   :  { %v1613_v57 = vpop.f32.mrf.mxu2 }
 0xf24   :  { %v1614_v9 = vadd.f32 %v1613_v57, %v1590_v34 }
 0xf2b   :  { %v1615_v56 = vpop.f32.mrf.mxu2 }
 0xf2c   :  { %v1636_v59 = vpop.f32.mrf.mxu3  ;;  %v1616_v37 = vadd.f32 %v1615_v56, %v1592_v45 }
 0xf2d   :  { %v1641_v13 = vadd.f32 %v1636_v59, %v1614_v9 }
 0xf34   :  { %v1638_v7 = vpop.f32.mrf.mxu3 }
 0xf35   :  { %v1661_v63 = vpop.f32.mrf.mxu1  ;;  %v1642_v11 = vadd.f32 %v1638_v7, %v1616_v37 }
 0xf36   :  { %v1666_v16 = vadd.f32 %v1661_v63, %v1641_v13 }
 0xf3d   :  { %v1663_v12 = vpop.f32.mrf.mxu1 }
 0xf3e   :  { %v1667_v49 = vadd.f32 %v1663_v12, %v1642_v11 }
 0xf40   :  { %v1668_v17 = vpack.c.bf16 %v1667_v49, %v1666_v16 }
 0xf42   :  { %2359 = vmatmul.msk.bf16.vlgmr.msra.gmra.mxu2 %vm154_vm0, %v1668_v17 }
 0xfc5   :  { %v1694_v48 = vpop.f32.mrf.mxu2 }
 0xfc6   :  { %v1695_v8 = vadd.f32 %v1694_v48, %v1669_v52 }
 0xfcd   :  { %v1696_v26 = vpop.f32.mrf.mxu2 }
 0xfce   :  { %v1697_v51 = vadd.f32 %v1696_v26, %v1669_v52 }
 0xfd0   :  { %v1699_v27 = vpack.c.bf16 %v1697_v51, %v1695_v8 }
 0xfd2   :  { %2360 = vmatmul.msk.bf16.vlgmr.msra.gmra.mxu3 %vm154_vm0, %v1699_v27 }
0x1055   :  { %v1712_v0 = vpop.f32.mrf.mxu3 }
0x1056   :  { %v1720_v28 = vmul.f32 %v3173_v3, %v1712_v0  ;;  %v1718_v55 = vmul.f32 %v3179_v42, %v1712_v0  ;;  %v1722_v29 = vmul.f32 %v3185_v25, %v1712_v0  ;;  %v1724_v31 = vmul.f32 %v3191_v1, %v1712_v0 }
0x1058   :  { %v1728_v19 = vpack.c.bf16 %v1720_v28, %v1720_v28  ;;  %v1726_v24 = vpack.c.bf16 %v1718_v55, %v1718_v55  ;;  %v1730_v32 = vpack.c.bf16 %v1722_v29, %v1722_v29  ;;  %v1732_v54 = vpack.c.bf16 %v1724_v31, %v1724_v31 }
0x105a   :  { %v1744_v41 = vunpack.c.l.b16 %v1728_v19  ;;  %v1742_v62 = vunpack.c.l.b16 %v1726_v24  ;;  %v1746_v39 = vunpack.c.l.b16 %v1730_v32  ;;  %v1748_v35 = vunpack.c.l.b16 %v1732_v54 }
0x105d   :  { %v1714_v61 = vpop.f32.mrf.mxu3 }
0x105e   :  { %v1719_v30 = vmul.f32 %v3197_v6, %v1714_v61  ;;  %v1721_v33 = vmul.f32 %v3203_v38, %v1714_v61  ;;  %v1723_v14 = vmul.f32 %v3209_v40, %v1714_v61  ;;  %v1725_v21 = vmul.f32 %v3215_v60, %v1714_v61 }
0x105f   :  { %v1717_v3 = vpack.c.bf16 %v1714_v61, %v1712_v0 }
0x1060   :  { %v1727_v42 = vpack.c.bf16 %v1719_v30, %v1719_v30  ;;  %v1729_v2 = vpack.c.bf16 %v1721_v33, %v1721_v33  ;;  %v1731_v25 = vpack.c.bf16 %v1723_v14, %v1723_v14  ;;  %v1733_v5 = vpack.c.bf16 %v1725_v21, %v1725_v21 }
0x1061   :  { %v1767_v1 = vsel %vm154_vm0, %v1717_v3, 0 }
0x1062   :  { %1776 = vmatpush.bf16.xpose.msra.mxu1 %v1767_v1  ;;  %v1745_v47 = vunpack.c.l.b16 %v1729_v2  ;;  %v1743_v6 = vunpack.c.l.b16 %v1727_v42  ;;  %v1747_v43 = vunpack.c.l.b16 %v1731_v25  ;;  %v1749_v38 = vunpack.c.l.b16 %v1733_v5 }
0x1064   :  { %v1751_v18 = vpack.c.b16 %v1745_v47, %v1744_v41  ;;  %v1750_v40 = vpack.c.b16 %v1743_v6, %v1742_v62  ;;  %v1752_v4 = vpack.c.b16 %v1747_v43, %v1746_v39  ;;  %v1753_v60 = vpack.c.b16 %v1749_v38, %v1748_v35 }
0x1066   :  { %1926 = vmatpush.bf16.msrb.mxu2 %v1751_v18  ;;  %1949 = vmatpush.bf16.msrb.mxu3 %v1750_v40 }
0x1069   :  { %2361 = vmatmul.msk.bf16.vlgmr.msra.gmra.mxu1 %vm154_vm0, %v1750_v40 }
0x106a   :  { %1972 = vmatpush.bf16.msra.mxu2 %v1752_v4  ;;  %1997 = vmatpush.bf16.msra.mxu3 %v1753_v60 }
0x1079   :  { %2362 = vmatmul.msk.bf16.gmra.mxu1 %vm154_vm0, %v1751_v18 }
0x1089   :  { %2363 = vmatmul.msk.bf16.gmra.mxu1 %vm154_vm0, %v1752_v4 }
0x1099   :  { %2364 = vmatmul.msk.bf16.gmra.mxu1 %vm154_vm0, %v1753_v60 }
0x10e6   :  { %v1778_v36 = vpop.f32.mrf.mxu1 }
0x10e7   :  { %v1798_v34 = vmul.f32 0.35355338, %v1778_v36 }
0x10e9   :  { %v1806_v45 = vadd.f32 %v3239_v10, %v1798_v34 }
0x10eb   :  { %v1814_v57 = vsel %vm595_vm10, %v1806_v45, -inf }
0x10ec   :  { %1815 = vmax.xlane.f32.xlu1 %v1814_v57 }
0x10ee   :  { %v1780_v59 = vpop.f32.mrf.mxu1 }
0x10ef   :  { %v1799_v9 = vmul.f32 0.35355338, %v1780_v59 }
0x10f1   :  { %v1807_v12 = vadd.f32 %v3253_v53, %v1799_v9 }
0x10f3   :  { %v1817_v10 = vsel %vm595_vm10, %v1807_v12, -inf }
0x10f6   :  { %v1783_v63 = vpop.f32.mrf.mxu1 }
0x10f7   :  { %v1800_v56 = vmul.f32 0.35355338, %v1783_v63 }
0x10f9   :  { %v1808_v7 = vadd.f32 %v3232_v15, %v1800_v56 }
0x10fb   :  { %v1820_v37 = vsel %vm595_vm10, %v1808_v7, -inf }
0x10fc   :  { %1821 = vmax.xlane.f32.xlu0 %v1820_v37 }
0x10fe   :  { %v1785_v13 = vpop.f32.mrf.mxu1 }
0x10ff   :  { %v1801_v11 = vmul.f32 0.35355338, %v1785_v13 }
0x1101   :  { %v1809_v16 = vadd.f32 %v3245_v23, %v1801_v11 }
0x1103   :  { %v1823_v49 = vsel %vm595_vm10, %v1809_v16, -inf }
0x1104   :  { %1818 = vmax.xlane.f32.xlu0 %v1817_v10  ;;  %1824 = vmax.xlane.f32.xlu2 %v1823_v49 }
0x1106   :  { %v1788_v17 = vpop.f32.mrf.mxu1 }
0x1107   :  { %v1802_v48 = vmul.f32 0.35355338, %v1788_v17 }
0x1109   :  { %v1810_v15 = vadd.f32 %v3260_v58, %v1802_v48 }
0x110b   :  { %v1826_v52 = vsel %vm595_vm10, %v1810_v15, -inf }
0x110c   :  { %1827 = vmax.xlane.f32.xlu2 %v1826_v52 }
0x110e   :  { %v1790_v26 = vpop.f32.mrf.mxu1 }
0x110f   :  { %v1803_v8 = vmul.f32 0.35355338, %v1790_v26 }
0x1111   :  { %v1811_v51 = vadd.f32 %v3266_v44, %v1803_v8 }
0x1113   :  { %v1829_v53 = vsel %vm595_vm10, %v1811_v51, -inf }
0x1114   :  { %1830 = vmax.xlane.f32.xlu1 %v1829_v53 }
0x1116   :  { %v1793_v23 = vpop.f32.mrf.mxu1 }
0x1117   :  { %v1804_v27 = vmul.f32 0.35355338, %v1793_v23 }
0x1119   :  { %v1812_v0 = vadd.f32 %v3274_v46, %v1804_v27 }
0x111b   :  { %v1832_v28 = vsel %vm595_vm10, %v1812_v0, -inf }
0x111c   :  { %1833 = vmax.xlane.f32.xlu0 %v1832_v28 }
0x111e   :  { %v1795_v55 = vpop.f32.mrf.mxu1 }
0x111f   :  { %v1805_v29 = vmul.f32 0.35355338, %v1795_v55 }
0x1121   :  { %v1813_v58 = vadd.f32 %v3281_v50, %v1805_v29 }
0x1123   :  { %v1835_v31 = vsel %vm595_vm10, %v1813_v58, -inf }
0x1124   :  { %1836 = vmax.xlane.f32.xlu2 %v1835_v31 }
0x115f   :  { %v1816_v19 = vpop.xlane.xlu1 %1815 }
0x1160   :  { %v1838_v24 = vsub.f32 %v1806_v45, %v1816_v19 }
0x1162   :  { %v1846_v44 = vmul.f32 1.442695, %v1838_v24 }
0x1164   :  { %2548 = vpow2.f32 %v1846_v44  ;;  %v2422_v44 = vld [vmem:[%s3396_s9 + $0x38] sm:$0xff] }
0x1165   :  { %2029 = vmatpush.bf16.msrb.mxu0 %v2422_v44 }
0x116a   :  { %v2549_v32 = vpop.eup %2548 }
0x116b   :  { %v1862_v54 = vsel %vm595_vm10, %v2549_v32, 0.0 }
0x116c   :  { %1863 = vadd.xlane.f32.xlu2 %v1862_v54 }
0x116f   :  { %v1822_v61 = vpop.xlane.xlu0 %1821 }
0x1170   :  { %v1840_v46 = vsub.f32 %v1808_v7, %v1822_v61 }
0x1172   :  { %v1850_v30 = vmul.f32 1.442695, %v1840_v46 }
0x1174   :  { %2550 = vpow2.f32 %v1850_v30 }
0x1177   :  { %v1819_v33 = vpop.xlane.xlu0 %1818  ;;  %v1825_v14 = vpop.xlane.xlu2 %1824 }
0x1178   :  { %v1839_v21 = vsub.f32 %v1807_v12, %v1819_v33  ;;  %v1841_v3 = vsub.f32 %v1809_v16, %v1825_v14 }
0x117a   :  { %v2551_v50 = vpop.eup %2550  ;;  %v1848_v41 = vmul.f32 1.442695, %v1839_v21  ;;  %v1852_v42 = vmul.f32 1.442695, %v1841_v3 }
0x117b   :  { %v1868_v2 = vsel %vm595_vm10, %v2551_v50, 0.0 }
0x117c   :  { %2552 = vpow2.f32 %v1848_v41  ;;  %1869 = vadd.xlane.f32.xlu1 %v1868_v2 }
0x117d   :  { %2554 = vpow2.f32 %v1852_v42 }
0x117f   :  { %v1828_v25 = vpop.xlane.xlu2 %1827 }
0x1180   :  { %v1842_v5 = vsub.f32 %v1810_v15, %v1828_v25 }
0x1182   :  { %v2553_v1 = vpop.eup %2552  ;;  %v1854_v62 = vmul.f32 1.442695, %v1842_v5 }
0x1183   :  { %v2555_v39 = vpop.eup %2554  ;;  %v1865_v35 = vsel %vm595_vm10, %v2553_v1, 0.0 }
0x1184   :  { %2556 = vpow2.f32 %v1854_v62  ;;  %1866 = vadd.xlane.f32.xlu1 %v1865_v35  ;;  %v1871_v47 = vsel %vm595_vm10, %v2555_v39, 0.0 }
0x1185   :  { %1872 = vadd.xlane.f32.xlu0 %v1871_v47 }
0x1187   :  { %v1831_v6 = vpop.xlane.xlu1 %1830 }
0x1188   :  { %v1843_v43 = vsub.f32 %v1811_v51, %v1831_v6  ;;  %v2421_v6 = vld [vmem:[%s3396_s9 + $0x30] sm:$0xff] }
0x1189   :  { %2030 = vmatpush.bf16.msrb.mxu0 %v2421_v6 }
0x118a   :  { %v2557_v38 = vpop.eup %2556  ;;  %v1856_v18 = vmul.f32 1.442695, %v1843_v43 }
0x118b   :  { %v1874_v40 = vsel %vm595_vm10, %v2557_v38, 0.0 }
0x118c   :  { %2558 = vpow2.f32 %v1856_v18 }
0x118d   :  { %1875 = vadd.xlane.f32.xlu0 %v1874_v40 }
0x118f   :  { %v1834_v4 = vpop.xlane.xlu0 %1833 }
0x1190   :  { %v1844_v60 = vsub.f32 %v1812_v0, %v1834_v4 }
0x1192   :  { %v2559_v36 = vpop.eup %2558  ;;  %v1858_v34 = vmul.f32 1.442695, %v1844_v60 }
0x1193   :  { %v1877_v45 = vsel %vm595_vm10, %v2559_v36, 0.0 }
0x1194   :  { %2560 = vpow2.f32 %v1858_v34  ;;  %1878 = vadd.xlane.f32.xlu2 %v1877_v45 }
0x1197   :  { %v1837_v57 = vpop.xlane.xlu2 %1836 }
0x1198   :  { %v1845_v59 = vsub.f32 %v1813_v58, %v1837_v57 }
0x119a   :  { %v2561_v63 = vpop.eup %2560  ;;  %v1860_v56 = vmul.f32 1.442695, %v1845_v59 }
0x119b   :  { %v1880_v7 = vsel %vm595_vm10, %v2561_v63, 0.0 }
0x119c   :  { %2562 = vpow2.f32 %v1860_v56  ;;  %1881 = vadd.xlane.f32.xlu1 %v1880_v7 }
0x11a2   :  { %v2563_v9 = vpop.eup %2562 }
0x11a3   :  { %v1883_v37 = vsel %vm595_vm10, %v2563_v9, 0.0 }
0x11a4   :  { %1884 = vadd.xlane.f32.xlu0 %v1883_v37  ;;  %v2627_v37 = vld [vmem:[%s3397_s10] sm:$0xff] }
0x11df   :  { %v1864_v13 = vpop.xlane.xlu2 %1863 }
0x11e0   :  { %2564 = vrcp.f32 %v1864_v13  ;;  %v2007_v13 = vperm.slane %v2627_v37, 5 }
0x11e6   :  { %v2565_v16 = vpop.eup %2564 }
0x11e7   :  { %v1894_v17 = vmul.f32 %v2565_v16, %v2549_v32 }
0x11e9   :  { %v1902_v26 = vpack.c.bf16 %v1894_v17, %v1894_v17 }
0x11eb   :  { %v1935_v28 = vunpack.c.l.b16 %v1902_v26 }
0x11ef   :  { %v1870_v11 = vpop.xlane.xlu1 %1869 }
0x11f0   :  { %2566 = vrcp.f32 %v1870_v11 }
0x11f6   :  { %v2567_v49 = vpop.eup %2566 }
0x11f7   :  { %v1867_v12 = vpop.xlane.xlu1 %1866  ;;  %v1896_v48 = vmul.f32 %v2567_v49, %v2551_v50 }
0x11f8   :  { %2568 = vrcp.f32 %v1867_v12  ;;  %v1873_v10 = vpop.xlane.xlu0 %1872 }
0x11f9   :  { %2570 = vrcp.f32 %v1873_v10  ;;  %v1904_v51 = vpack.c.bf16 %v1896_v48, %v1896_v48 }
0x11fb   :  { %v1912_v29 = vunpack.c.l.b16 %v1904_v51 }
0x11fe   :  { %v2569_v15 = vpop.eup %2568 }
0x11ff   :  { %v2571_v52 = vpop.eup %2570  ;;  %v1895_v8 = vmul.f32 %v2569_v15, %v2553_v1 }
0x1200   :  { %v1897_v53 = vmul.f32 %v2571_v52, %v2555_v39  ;;  %v1876_v23 = vpop.xlane.xlu0 %1875 }
0x1201   :  { %v1903_v27 = vpack.c.bf16 %v1895_v8, %v1895_v8  ;;  %2572 = vrcp.f32 %v1876_v23 }
0x1202   :  { %v1905_v0 = vpack.c.bf16 %v1897_v53, %v1897_v53 }
0x1203   :  { %v1936_v55 = vunpack.c.l.b16 %v1903_v27 }
0x1204   :  { %v1913_v58 = vunpack.c.l.b16 %v1905_v0 }
0x1205   :  { %v1937_v31 = vpack.c.b16 %v1936_v55, %v1935_v28 }
0x1206   :  { %v1914_v19 = vpack.c.b16 %v1913_v58, %v1912_v29 }
0x1207   :  { %2366 = vmatmul.msk.bf16.vlgmr.msrb.gmra.mxu3 %vm595_vm10, %v1937_v31  ;;  %v1879_v24 = vpop.xlane.xlu2 %1878  ;;  %v2573_v32 = vpop.eup %2572 }
0x1208   :  { %2365 = vmatmul.msk.bf16.vlgmr.msrb.gmra.mxu2 %vm595_vm10, %v1914_v19  ;;  %2574 = vrcp.f32 %v1879_v24  ;;  %v1898_v54 = vmul.f32 %v2573_v32, %v2557_v38 }
0x120a   :  { %v1906_v46 = vpack.c.bf16 %v1898_v54, %v1898_v54 }
0x120c   :  { %v1958_v21 = vunpack.c.l.b16 %v1906_v46 }
0x120e   :  { %v2575_v61 = vpop.eup %2574 }
0x120f   :  { %v1899_v30 = vmul.f32 %v2575_v61, %v2559_v36  ;;  %v1882_v33 = vpop.xlane.xlu1 %1881 }
0x1210   :  { %2576 = vrcp.f32 %v1882_v33 }
0x1211   :  { %v1907_v14 = vpack.c.bf16 %v1899_v30, %v1899_v30 }
0x1213   :  { %v1959_v3 = vunpack.c.l.b16 %v1907_v14  ;;  %v2081_v14 = vperm.slane %v2627_v37, 7 }
0x1215   :  { %v1960_v50 = vpack.c.b16 %v1959_v3, %v1958_v21 }
0x1216   :  { %v2577_v42 = vpop.eup %2576 }
0x1217   :  { %v1885_v41 = vpop.xlane.xlu0 %1884  ;;  %v1900_v2 = vmul.f32 %v2577_v42, %v2561_v63 }
0x1218   :  { %2578 = vrcp.f32 %v1885_v41  ;;  %2367 = vmatmul.msk.bf16.vlgmr.msra.gmra.mxu2 %vm595_vm10, %v1960_v50  ;;  %v2084_v41 = vperm.slane %v3163_v22, 1 }
0x1219   :  { %v1908_v5 = vpack.c.bf16 %v1900_v2, %v1900_v2 }
0x121b   :  { %v1983_v39 = vunpack.c.l.b16 %v1908_v5 }
0x121e   :  { %v2579_v25 = vpop.eup %2578 }
0x121f   :  { %v1901_v1 = vmul.f32 %v2579_v25, %v2563_v9 }
0x1221   :  { %v1909_v62 = vpack.c.bf16 %v1901_v1, %v1901_v1 }
0x1223   :  { %v1984_v35 = vunpack.c.l.b16 %v1909_v62 }
0x1225   :  { %v1985_v47 = vpack.c.b16 %v1984_v35, %v1983_v39 }
0x1227   :  { %2368 = vmatmul.msk.bf16.vlgmr.msra.gmra.mxu3 %vm595_vm10, %v1985_v47 }
0x128a   :  { %v1951_v38 = vpop.f32.mrf.mxu3 }
0x128b   :  { %v1928_v43 = vpop.f32.mrf.mxu2 }
0x128c   :  { %v1952_v34 = vadd.f32 %v1951_v38, %v1928_v43 }
0x1292   :  { %v1953_v40 = vpop.f32.mrf.mxu3 }
0x1293   :  { %v1930_v18 = vpop.f32.mrf.mxu2 }
0x1294   :  { %v1954_v45 = vadd.f32 %v1953_v40, %v1930_v18 }
0x129b   :  { %v1974_v4 = vpop.f32.mrf.mxu2 }
0x129c   :  { %v1979_v57 = vadd.f32 %v1974_v4, %v1952_v34 }
0x12a3   :  { %v1976_v36 = vpop.f32.mrf.mxu2 }
0x12a4   :  { %v1980_v59 = vadd.f32 %v1976_v36, %v1954_v45 }
0x12aa   :  { %v1999_v60 = vpop.f32.mrf.mxu3 }
0x12ab   :  { %v2004_v56 = vadd.f32 %v1999_v60, %v1979_v57 }
0x12b2   :  { %v2001_v63 = vpop.f32.mrf.mxu3 }
0x12b3   :  { %v2005_v7 = vadd.f32 %v2001_v63, %v1980_v59  ;;  %v2424_v59 = vld [vmem:[%s3398_s11 + $0x8] sm:$0xff] }
0x12b4   :  { %2159 = vmatpush.bf16.msrb.mxu2 %v2424_v59 }
0x12b5   :  { %v2006_v9 = vpack.c.bf16 %v2005_v7, %v2004_v56 }
0x12b7   :  { %2377 = vmatmul.msk.bf16.vlgmr.msrb.gmra.mxu0 %vm154_vm0, %v2006_v9  ;;  %v2423_v9 = vld [vmem:[%s3398_s11] sm:$0xff] }
0x12b8   :  { %2160 = vmatpush.bf16.msrb.mxu2 %v2423_v9 }
0x1334   :  { %v2032_v11 = vpop.f32.mrf.mxu0 }
0x1335   :  { %v2033_v12 = vadd.f32 %v2032_v11, %v2007_v13 }
0x1337   :  { %v2037_v16 = vsel %vm154_vm0, %v2033_v12, 0.0 }
0x1338   :  { %2038 = vadd.xlane.f32.xlu2 %v2037_v16 }
0x133c   :  { %v2034_v10 = vpop.f32.mrf.mxu0 }
0x133d   :  { %v2035_v49 = vadd.f32 %v2034_v10, %v2007_v13 }
0x133f   :  { %v2040_v17 = vsel %vm154_vm0, %v2035_v49, 0.0 }
0x1340   :  { %2041 = vadd.xlane.f32.xlu1 %v2040_v17 }
0x13ab   :  { %v2039_v48 = vpop.xlane.xlu2 %2038 }
0x13ac   :  { %v2043_v15 = vmul.f32 %v2039_v48, %v3151_v20 }
0x13ae   :  { %v2045_v52 = vsub.f32 %v2033_v12, %v2043_v15 }
0x13b0   :  { %v2047_v26 = vmul.f32 %v2045_v52, %v2045_v52 }
0x13b2   :  { %v2049_v8 = vsel %vm154_vm0, %v2047_v26, 0.0 }
0x13b3   :  { %v2042_v51 = vpop.xlane.xlu1 %2041  ;;  %2050 = vadd.xlane.f32.xlu0 %v2049_v8 }
0x13b4   :  { %v2044_v53 = vmul.f32 %v2042_v51, %v3151_v20 }
0x13b6   :  { %v2046_v23 = vsub.f32 %v2035_v49, %v2044_v53 }
0x13b8   :  { %v2048_v27 = vmul.f32 %v2046_v23, %v2046_v23 }
0x13ba   :  { %v2052_v0 = vsel %vm154_vm0, %v2048_v27, 0.0 }
0x13bb   :  { %2053 = vadd.xlane.f32.xlu2 %v2052_v0 }
0x1426   :  { %v2051_v28 = vpop.xlane.xlu0 %2050 }
0x1427   :  { %v2055_v55 = vmul.f32 %v2051_v28, %v3151_v20 }
0x1429   :  { %v2057_v29 = vadd.f32 1e-05, %v2055_v55 }
0x142b   :  { %2580 = vrsqrt.f32 %v2057_v29  ;;  %vm2065_vm12 = vweird.f32 %v2057_v29 }
0x142e   :  { %v2054_v58 = vpop.xlane.xlu2 %2053 }
0x142f   :  { %v2056_v31 = vmul.f32 %v2054_v58, %v3151_v20 }
0x1431   :  { %v2581_v19 = vpop.eup %2580  ;;  %v2058_v24 = vadd.f32 1e-05, %v2056_v31 }
0x1432   :  { %v2060_v44 = vmul.f32 %v2581_v19, %v2057_v29  ;;  %vm2066_vm10 = vweird.f32 %v2581_v19 }
0x1433   :  { %2582 = vrsqrt.f32 %v2058_v24  ;;  %vm2067_vm13 = vmor %vm2065_vm12, %vm2066_vm10  ;;  %vm2075_vm15 = vweird.f32 %v2058_v24 }
0x1434   :  { %v2061_v32 = vmul.f32 %v2581_v19, %v2060_v44 }
0x1436   :  { %v2062_v54 = vmul.f32 0.5, %v2061_v32 }
0x1438   :  { %v2063_v61 = vsub.f32 1.5, %v2062_v54 }
0x1439   :  { %v2583_v46 = vpop.eup %2582 }
0x143a   :  { %v2064_v30 = vmul.f32 %v2581_v19, %v2063_v61  ;;  %v2070_v33 = vmul.f32 %v2583_v46, %v2058_v24  ;;  %vm2076_vm14 = vweird.f32 %v2583_v46 }
0x143b   :  { %vm2077_vm2 = vmor %vm2075_vm15, %vm2076_vm14 }
0x143c   :  { %v2071_v21 = vmul.f32 %v2583_v46, %v2070_v33  ;;  %v2068_v3 = vsel %vm2067_vm13, %v2581_v19, %v2064_v30 }
0x143d   :  { %v2079_v50 = vmul.f32 %v2068_v3, %v2045_v52 }
0x143e   :  { %v2072_v42 = vmul.f32 0.5, %v2071_v21 }
0x143f   :  { %v2082_v2 = vmul.f32 %v2081_v14, %v2079_v50 }
0x1440   :  { %v2073_v25 = vsub.f32 1.5, %v2072_v42 }
0x1441   :  { %v2085_v5 = vadd.f32 %v2084_v41, %v2082_v2 }
0x1442   :  { %v2074_v1 = vmul.f32 %v2583_v46, %v2073_v25 }
0x1443   :  { %v2087_v62 = vsel %vm154_vm0, %v2085_v5, 0.0 }
0x1444   :  { %2088 = vadd.xlane.f32.xlu1 %v2087_v62  ;;  %v2078_v39 = vsel %vm2077_vm2, %v2583_v46, %v2074_v1 }
0x1445   :  { %v2080_v35 = vmul.f32 %v2078_v39, %v2046_v23 }
0x1447   :  { %v2083_v47 = vmul.f32 %v2081_v14, %v2080_v35 }
0x1449   :  { %v2086_v6 = vadd.f32 %v2084_v41, %v2083_v47 }
0x144b   :  { %v2090_v43 = vsel %vm154_vm0, %v2086_v6, 0.0 }
0x144c   :  { %2091 = vadd.xlane.f32.xlu0 %v2090_v43 }
0x14b7   :  { %v2089_v38 = vpop.xlane.xlu1 %2088 }
0x14b8   :  { %v2093_v22 = vmul.f32 %v2089_v38, %v3151_v20 }
0x14ba   :  { %v2095_v18 = vsub.f32 %v2085_v5, %v2093_v22 }
0x14bc   :  { %v2097_v40 = vmul.f32 %v2095_v18, %v2095_v18 }
0x14be   :  { %v2099_v4 = vsel %vm154_vm0, %v2097_v40, 0.0 }
0x14bf   :  { %2100 = vadd.xlane.f32.xlu2 %v2099_v4  ;;  %v2092_v60 = vpop.xlane.xlu0 %2091 }
0x14c0   :  { %v2094_v36 = vmul.f32 %v2092_v60, %v3151_v20 }
0x14c2   :  { %v2096_v34 = vsub.f32 %v2086_v6, %v2094_v36 }
0x14c4   :  { %v2098_v45 = vmul.f32 %v2096_v34, %v2096_v34 }
0x14c6   :  { %v2102_v57 = vsel %vm154_vm0, %v2098_v45, 0.0 }
0x14c7   :  { %2103 = vadd.xlane.f32.xlu1 %v2102_v57 }
0x1532   :  { %v2101_v63 = vpop.xlane.xlu2 %2100 }
0x1533   :  { %v2105_v56 = vmul.f32 %v2101_v63, %v3151_v20 }
0x1535   :  { %v2107_v7 = vadd.f32 1e-05, %v2105_v56 }
0x1537   :  { %2584 = vrsqrt.f32 %v2107_v7  ;;  %vm2115_vm4 = vweird.f32 %v2107_v7 }
0x153a   :  { %v2104_v37 = vpop.xlane.xlu1 %2103 }
0x153b   :  { %v2106_v13 = vmul.f32 %v2104_v37, %v3151_v20  ;;  %v2628_v20 = vld [vmem:[%s3397_s10 + $0x8] sm:$0xff] }
0x153c   :  { %v2131_v23 = vperm.slane %v2628_v20, 2  ;;  %v2134_v55 = vperm.slane %v2628_v20, 3 }
0x153d   :  { %v2585_v11 = vpop.eup %2584  ;;  %v2108_v12 = vadd.f32 1e-05, %v2106_v13 }
0x153e   :  { %v2110_v16 = vmul.f32 %v2585_v11, %v2107_v7  ;;  %vm2116_vm3 = vweird.f32 %v2585_v11 }
0x153f   :  { %2586 = vrsqrt.f32 %v2108_v12  ;;  %vm2117_vm5 = vmor %vm2115_vm4, %vm2116_vm3  ;;  %vm2125_vm6 = vweird.f32 %v2108_v12 }
0x1540   :  { %v2111_v10 = vmul.f32 %v2585_v11, %v2110_v16 }
0x1542   :  { %v2112_v49 = vmul.f32 0.5, %v2111_v10 }
0x1544   :  { %v2113_v17 = vsub.f32 1.5, %v2112_v49 }
0x1545   :  { %v2587_v48 = vpop.eup %2586 }
0x1546   :  { %v2114_v15 = vmul.f32 %v2585_v11, %v2113_v17  ;;  %v2120_v52 = vmul.f32 %v2587_v48, %v2108_v12  ;;  %vm2126_vm1 = vweird.f32 %v2587_v48 }
0x1547   :  { %vm2127_vm7 = vmor %vm2125_vm6, %vm2126_vm1 }
0x1548   :  { %v2121_v26 = vmul.f32 %v2587_v48, %v2120_v52  ;;  %v2118_v8 = vsel %vm2117_vm5, %v2585_v11, %v2114_v15 }
0x1549   :  { %v2129_v27 = vmul.f32 %v2118_v8, %v2095_v18 }
0x154a   :  { %v2122_v51 = vmul.f32 0.5, %v2121_v26 }
0x154b   :  { %v2132_v29 = vmul.f32 %v2131_v23, %v2129_v27 }
0x154c   :  { %v2123_v53 = vsub.f32 1.5, %v2122_v51 }
0x154d   :  { %v2135_v19 = vadd.f32 %v2134_v55, %v2132_v29 }
0x154e   :  { %v2124_v0 = vmul.f32 %v2587_v48, %v2123_v53 }
0x1550   :  { %v2128_v28 = vsel %vm2127_vm7, %v2587_v48, %v2124_v0 }
0x1551   :  { %v2130_v58 = vmul.f32 %v2128_v28, %v2096_v34 }
0x1553   :  { %v2133_v31 = vmul.f32 %v2131_v23, %v2130_v58 }
0x1555   :  { %v2136_v24 = vadd.f32 %v2134_v55, %v2133_v31 }
0x1557   :  { %v2137_v44 = vpack.c.bf16 %v2136_v24, %v2135_v19 }
0x1559   :  { %2386 = vmatmul.msk.bf16.vlgmr.msrb.gmra.mxu2 %vm154_vm0, %v2137_v44 }
0x15dc   :  { %v2162_v32 = vpop.f32.mrf.mxu2 }
0x15dd   :  { %2167 = vst [vmem:[#allocation2] sm:$0xff] %v2162_v32 }
0x15e4   :  { %v2164_v54 = vpop.f32.mrf.mxu2 }
0x15e5   :  { %2168 = vst [vmem:[#allocation2 + $0x8] sm:$0xff] %v2164_v54 }
0x15e6   :  { %2181 = dma.vmem_to_hbm [thread:$0]  %s2174_s22, 256, %s2176_s24, [#allocation3], %s2658_s25, %s2658_s25, %s2659_s26  }
0x15e7   :  { %2653 = dma.done.wait [#allocation3], 256  }
0x15e8   :  { %2654 = vsyncadd [#allocation3], 4294967040 }
0x15e9   :  { %2186 = vsyncpa [#allocation3], 1 }

</bundles_post_ra>
